<compile_context>
chip_gen: v6e
topology: v6e:2x2x1
jax: 0.10.0
libtpu: 0.0.40
codegen_flags: <defaults>
</compile_context>

<pallas_src>
import jax
import jax.numpy as jnp
from jax import lax
from jax.experimental import pallas as pl
from jax.experimental.pallas import tpu as pltpu

LANE = 128


def _round_up(v, m):
    return (v + m - 1) // m * m


def _pick_strip_h(h, w, target_rows, prefer_even_strips=False):
    """H-strip height th (th | h): keep th*w <= target_rows, >1 strip when possible."""
    divisors = [t for t in range(1, h + 1) if h % t == 0]
    fitting = [t for t in divisors if t * w <= max(target_rows, w)] or [1]
    th = max(fitting)
    if th == h and h >= 16:  # force >=2 strips so the pipeline / megacore have work
        smaller = [t for t in fitting if t < h] or [t for t in divisors if t < h]
        if smaller:
            th = max(smaller)
    if prefer_even_strips and (h // th) % 2 == 1:  # v7x: keep both TCs busy when n==1
        evens = [t for t in fitting if (h // t) % 2 == 0]
        if evens:
            th = max(evens)
    return th


# ---------------------------------------------------------------------------
# Pallas kernel: im2col (once per strip) + single matmul + bias + SiLU
# ---------------------------------------------------------------------------
def _make_kernel(th, w, cp_in, tcout, resident):
    def kernel(x_ref, halo_ref, w_ref, b_ref, out_ref, xpad_ref, col_ref):
        # x_ref   : (th, w, cp_in)         bf16 interior rows of this H-strip
        # halo_ref: (2, w, cp_in)          bf16 rows above/below the strip (zero at edges)
        # w_ref   : (jc, 9*cp_in, tcout)   bf16 fused conv*BN kernel  (resident)
        #           (9*cp_in, tcout)                              (non-resident fallback)
        # b_ref   : (jc, 1, tcout)         f32 fused bias (always resident, tiny)
        # out_ref : (th, w, tcout)         bf16
        # xpad_ref: (th+2, w+2, cp_in)     bf16 scratch: zero-padded haloed strip
        # col_ref : (th*w, 9*cp_in)        bf16 scratch: im2col operand of this strip
        j = pl.program_id(2)

        # Build the padded strip + its im2col matrix only on the first Cout-tile
        # visit of each (batch, strip).  Correct because the Cout axis is the
        # innermost grid axis and marked "arbitrary" (sequential per core); do not
        # reorder grid axes / dimension_semantics without updating this guard.
        @pl.when(j == 0)
        def _build():
            # Zero only the two W-border columns (incl. corners); interior rows and
            # halo rows are fully overwritten below.
            zcol = jnp.zeros((th + 2, 1, cp_in), jnp.bfloat16)
            xpad_ref[:, 0:1, :] = zcol
            xpad_ref[:, w + 1:w + 2, :] = zcol
            xpad_ref[1:th + 1, 1:w + 1, :] = x_ref[...]
            halo = halo_ref[...]                                   # (2, w, cp_in)
            xpad_ref[0:1, 1:w + 1, :] = halo[0:1]                  # row above strip
            xpad_ref[th + 1:th + 2, 1:w + 1, :] = halo[1:2]        # row below strip

            # im2col: col[(y*w+x), (3*ky+kx)*cp_in + c] = xpad[y+ky, x+kx, c].
            # 3 column-shifted strips (one relayout each, once per strip); every ky
            # tap is an aligned row window (offset ky*w, w % 8 == 0); every tap write
            # lands at a lane offset t*cp_in (multiple of 128).
            for kx in range(3):
                s = xpad_ref[:, kx:kx + w, :].reshape((th + 2) * w, cp_in)
                for ky in range(3):
                    t = 3 * ky + kx
                    col_ref[:, t * cp_in:(t + 1) * cp_in] = s[ky * w:ky * w + th * w, :]

        # Single MXU matmul with K = 9*cp_in (taps folded into the contraction dim).
        wt = w_ref[j] if resident else w_ref[...]                  # (9*cp_in, tcout)
        acc = jnp.dot(col_ref[...], wt, preferred_element_type=jnp.float32)
        acc = acc + b_ref[j]                                       # fused conv+BN bias
        # SiLU = x * sigmoid(x): exp and approx reciprocal both go to the EUP.
        y = acc * pl.reciprocal(1.0 + jnp.exp(-acc), approx=True)
        out_ref[...] = y.reshape(th, w, tcout).astype(out_ref.dtype)

    return kernel


# ---------------------------------------------------------------------------
# Wrapper: conv+BN fusion, padding, strip tiling, pallas_call
# ---------------------------------------------------------------------------
def conv_bn_silu_nhwc(x_nhwc, w_oihw, conv_bias, gamma, beta, rmean, rvar, eps=1e-5):
    """Fused Conv2d(3x3, s=1, p=1, bias) + inference BatchNorm2d + SiLU. NHWC in,
    bf16 NHWC out (channel-padded output is sliced back to cout here for parity)."""
    n, h, w0, cin = x_nhwc.shape
    cout = w_oihw.shape[0]
    assert w_oihw.shape == (cout, cin, 3, 3), "only 3x3 kernels are supported"
    # TODO(synk): stride>1 / groups>1 Conv variants are not implemented (ConvWrapper
    # defaults kernel_size=3, stride=1, groups=1 are what this kernel covers).

    # ---- fold conv bias + BN (running stats) into a single kernel/bias ----
    s = gamma / jnp.sqrt(rvar + eps)                                   # (Cout,)
    w_fused = (w_oihw * s.reshape(-1, 1, 1, 1)).astype(jnp.float32)    # (Cout,Cin,3,3)
    b_fused = ((conv_bias - rmean) * s + beta).astype(jnp.float32)     # (Cout,)

    # ---- pad channels to lane multiples, W to a sublane multiple; bf16 feed ----
    cp_in = _round_up(cin, LANE)
    cp_out = _round_up(cout, LANE)
    w = _round_up(w0, 8)          # guarantees relayout-free in-kernel reshapes
    x_p = jnp.pad(x_nhwc, ((0, 0), (0, 0), (0, w - w0), (0, cp_in - cin))
                  ).astype(jnp.bfloat16)
    # TODO(synk): in production accept bf16 channel-padded NHWC from the producer and
    # keep the cp_out-padded output downstream to avoid these wrapper HBM passes.

    # ---- tile sizes: tcout=128 on v5e (128-wide MXU), 256 on v6e/v7x when possible;
    #      strip rows capped so the live f32 result tile stays <= ~128 KiB ----
    try:
        kind = jax.devices()[0].device_kind.lower()
    except Exception:
        kind = ""
    is_v5 = "v5" in kind
    tcout = 128 if (is_v5 or cp_out % 256 != 0) else 256
    jc = cp_out // tcout
    target_rows = 256 if tcout == 128 else 128
    th = _pick_strip_h(h, w, target_rows, prefer_even_strips=(n == 1))
    sh = h // th

    # ---- fused weights, tap-major (ky,kx,c), tiled over Cout: (jc, 9*cp_in, tcout) ----
    w_t = jnp.transpose(w_fused, (2, 3, 1, 0))                         # (3,3,cin,cout)
    w_t = jnp.pad(w_t, ((0, 0), (0, 0), (0, cp_in - cin), (0, cp_out - cout)))
    w_mat = w_t.reshape(9 * cp_in, cp_out)
    w_tiles = jnp.transpose(w_mat.reshape(9 * cp_in, jc, tcout), (1, 0, 2)
                            ).astype(jnp.bfloat16)                     # (jc,9cp_in,tcout)
    b_tiles = jnp.pad(b_fused, (0, cp_out - cout)).reshape(jc, 1, tcout)  # f32

    # ---- halo rows shipped as a tiny side tensor (2 rows per strip) ----
    zrow = jnp.zeros((n, 1, w, cp_in), jnp.bfloat16)
    if sh > 1:
        top = jnp.concatenate([zrow, x_p[:, th - 1:h - 1:th, :, :]], axis=1)
        bot = jnp.concatenate([x_p[:, th:h:th, :, :], zrow], axis=1)
    else:
        top, bot = zrow, zrow
    halo = jnp.stack([top, bot], axis=2)                               # (n,sh,2,w,cp_in)

    # ---- weight residency: keep the whole fused weight in VMEM when it fits ----
    w_bytes = 9 * cp_in * cp_out * 2
    resident = w_bytes <= (8 << 20)
    if resident:
        w_spec = pl.BlockSpec((jc, 9 * cp_in, tcout), lambda b, i, j: (0, 0, 0))
    else:
        w_spec = pl.BlockSpec((None, 9 * cp_in, tcout), lambda b, i, j: (j, 0, 0))

    # ---- right-sized VMEM limit from the actual per-step footprint + headroom ----
    blk_bytes = 2 * (th * w * cp_in * 2          # x block (double-buffered, bf16)
                     + 2 * w * cp_in * 2         # halo block
                     + th * w * tcout * 2)       # out block (bf16)
    blk_bytes += 2 * ((jc if resident else 1) * 9 * cp_in * tcout * 2   # weights
                      + jc * tcout * 4)                                 # bias
    scratch_bytes = (th + 2) * (w + 2) * cp_in * 2 + th * w * 9 * cp_in * 2
    vmem_limit = int(min(max(blk_bytes + scratch_bytes + (4 << 20), 16 << 20), 128 << 20))

    y = pl.pallas_call(
        _make_kernel(th, w, cp_in, tcout, resident),
        out_shape=jax.ShapeDtypeStruct((n, h, w, cp_out), jnp.bfloat16),
        grid_spec=pltpu.PrefetchScalarGridSpec(
            num_scalar_prefetch=0,
            grid=(n, sh, jc),
            in_specs=[
                pl.BlockSpec((None, th, w, cp_in), lambda b, i, j: (b, i, 0, 0)),
                pl.BlockSpec((None, None, 2, w, cp_in), lambda b, i, j: (b, i, 0, 0, 0)),
                w_spec,
                pl.BlockSpec((jc, 1, tcout), lambda b, i, j: (0, 0, 0)),
            ],
            out_specs=pl.BlockSpec((None, th, w, tcout), lambda b, i, j: (b, i, 0, j)),
            scratch_shapes=[
                pltpu.VMEM((th + 2, w + 2, cp_in), jnp.bfloat16),
                pltpu.VMEM((th * w, 9 * cp_in), jnp.bfloat16),
            ],
        ),
        compiler_params=pltpu.CompilerParams(
            dimension_semantics=("parallel", "parallel", "arbitrary"),
            vmem_limit_bytes=vmem_limit,
        ),
    )(x_p, halo, w_tiles, b_tiles)

    return y[:, :, :w0, :cout]


def conv_wrapper_forward_nchw(x_nchw, p):
    """PyTorch-layout adapter for testing. In production keep activations NHWC/bf16
    end-to-end and call conv_bn_silu_nhwc directly (avoids these transposes/casts)."""
    x_nhwc = jnp.transpose(x_nchw, (0, 2, 3, 1))
    y = conv_bn_silu_nhwc(x_nhwc, p["w"], p["b"], p["gamma"], p["beta"],
                          p["rmean"], p["rvar"])
    return jnp.transpose(y, (0, 3, 1, 2)).astype(jnp.float32)


# ---------------------------------------------------------------------------
# Deterministic parameters + pure-JAX reference (conv -> BN(eval) -> SiLU)
# ---------------------------------------------------------------------------
def make_params(key, cin, cout):
    ks = jax.random.split(key, 6)
    return {
        "w": 0.1 * jax.random.normal(ks[0], (cout, cin, 3, 3), jnp.float32),
        "b": 0.1 * jax.random.normal(ks[1], (cout,), jnp.float32),
        "gamma": 1.0 + 0.1 * jax.random.normal(ks[2], (cout,), jnp.float32),
        "beta": 0.1 * jax.random.normal(ks[3], (cout,), jnp.float32),
        "rmean": 0.1 * jax.random.normal(ks[4], (cout,), jnp.float32),
        "rvar": jnp.abs(jax.random.normal(ks[5], (cout,), jnp.float32)) + 0.5,
    }


def _reference(x_nchw, p, eps=1e-5):
    y = lax.conv_general_dilated(
        x_nchw, p["w"], window_strides=(1, 1), padding=[(1, 1), (1, 1)],
        dimension_numbers=("NCHW", "OIHW", "NCHW"))
    y = y + p["b"].reshape(1, -1, 1, 1)
    g = p["gamma"].reshape(1, -1, 1, 1)
    b = p["beta"].reshape(1, -1, 1, 1)
    m = p["rmean"].reshape(1, -1, 1, 1)
    v = p["rvar"].reshape(1, -1, 1, 1)
    y = (y - m) / jnp.sqrt(v + eps) * g + b
    return y * jax.nn.sigmoid(y)                                       # SiLU


if __name__ == "__main__":
    N, CIN, COUT, H, W = 2, 4, 8, 16, 16
    key = jax.random.PRNGKey(0)
    k_x, k_p = jax.random.split(key)
    x = jax.random.normal(k_x, (N, CIN, H, W), jnp.float32)
    params = make_params(k_p, CIN, COUT)

    out = conv_wrapper_forward_nchw(x, params)
    out = jax.block_until_ready(out)

    ref = _reference(x, params)
    assert out.shape == (N, COUT, H, W)
    err = float(jnp.max(jnp.abs(out - ref)))
    assert jnp.allclose(out, ref, atol=3e-2, rtol=3e-2), f"max abs err {err}"
    print("KERNEL_OK")
</pallas_src>

<mosaic_0001>
module attributes {stable_mosaic.version = 11 : i64} {
  func.func @kernel(%arg0: i32, %arg1: i32, %arg2: i32, %arg3: memref<1x8x16x128xbf16, #tpu.memory_space<vmem>>, %arg4: memref<1x1x2x16x128xbf16, #tpu.memory_space<vmem>>, %arg5: memref<1x1152x128xbf16, #tpu.memory_space<vmem>>, %arg6: memref<1x1x128xf32, #tpu.memory_space<vmem>>, %arg7: memref<1x8x16x128xbf16, #tpu.memory_space<vmem>>, %arg8: memref<10x18x128xbf16, #tpu.memory_space<vmem>>, %arg9: memref<128x1152xbf16, #tpu.memory_space<vmem>>) attributes {dimension_semantics = [#tpu.dimension_semantics<parallel>, #tpu.dimension_semantics<parallel>, #tpu.dimension_semantics<arbitrary>], iteration_bounds = array<i64: 2, 2, 1>, scalar_prefetch = 0 : i64, scratch_operands = 2 : i64, tpu.core_type = #tpu.core_type<tc>, window_params = [{transform_indices = @transform_0, window_bounds = array<i64: 1, 8, 16, 128>}, {transform_indices = @transform_1, window_bounds = array<i64: 1, 1, 2, 16, 128>}, {pipeline_mode = #tpu.pipeline_mode<synchronous>, transform_indices = @transform_2, window_bounds = array<i64: 1, 1152, 128>}, {pipeline_mode = #tpu.pipeline_mode<synchronous>, transform_indices = @transform_3, window_bounds = array<i64: 1, 1, 128>}, {transform_indices = @transform_4, window_bounds = array<i64: 1, 8, 16, 128>}]} {
    %c0_i32 = arith.constant 0 : i32
    %0 = arith.cmpi eq, %arg2, %c0_i32 : i32
    %1 = arith.extui %0 : i1 to i32
    %c0_i32_0 = arith.constant 0 : i32
    %2 = arith.cmpi ne, %1, %c0_i32_0 : i32
    scf.if %2 {
      %cst_12 = arith.constant 0.000000e+00 : bf16
      %25 = vector.broadcast %cst_12 : bf16 to vector<10x1x128xbf16>
      %c0_13 = arith.constant 0 : index
      %c0_14 = arith.constant 0 : index
      %c0_15 = arith.constant 0 : index
      %26 = vector.load %arg8[%c0_13, %c0_14, %c0_15] : memref<10x18x128xbf16, #tpu.memory_space<vmem>>, vector<10x1x128xbf16>
      tpu.vector_store %arg8[%c0_13, %c0_14, %c0_15], %25 {strides = array<i32>} : memref<10x18x128xbf16, #tpu.memory_space<vmem>>, vector<10x1x128xbf16>,
      %c0_16 = arith.constant 0 : index
      %c17 = arith.constant 17 : index
      %c0_17 = arith.constant 0 : index
      %27 = vector.load %arg8[%c0_16, %c17, %c0_17] : memref<10x18x128xbf16, #tpu.memory_space<vmem>>, vector<10x1x128xbf16>
      tpu.vector_store %arg8[%c0_16, %c17, %c0_17], %25 {strides = array<i32>} : memref<10x18x128xbf16, #tpu.memory_space<vmem>>, vector<10x1x128xbf16>,
      %c0_18 = arith.constant 0 : index
      %c0_19 = arith.constant 0 : index
      %c0_20 = arith.constant 0 : index
      %c0_21 = arith.constant 0 : index
      %28 = vector.load %arg3[%c0_18, %c0_19, %c0_20, %c0_21] : memref<1x8x16x128xbf16, #tpu.memory_space<vmem>>, vector<1x8x16x128xbf16>
      %29 = vector.shape_cast %28 : vector<1x8x16x128xbf16> to vector<8x16x128xbf16>
      %c1 = arith.constant 1 : index
      %c1_22 = arith.constant 1 : index
      %c0_23 = arith.constant 0 : index
      %30 = vector.load %arg8[%c1, %c1_22, %c0_23] : memref<10x18x128xbf16, #tpu.memory_space<vmem>>, vector<8x16x128xbf16>
      tpu.vector_store %arg8[%c1, %c1_22, %c0_23], %29 {strides = array<i32>} : memref<10x18x128xbf16, #tpu.memory_space<vmem>>, vector<8x16x128xbf16>,
      %c0_24 = arith.constant 0 : index
      %c0_25 = arith.constant 0 : index
      %c0_26 = arith.constant 0 : index
      %c0_27 = arith.constant 0 : index
      %c0_28 = arith.constant 0 : index
      %31 = vector.load %arg4[%c0_24, %c0_25, %c0_26, %c0_27, %c0_28] : memref<1x1x2x16x128xbf16, #tpu.memory_space<vmem>>, vector<1x1x2x16x128xbf16>
      %32 = vector.shape_cast %31 : vector<1x1x2x16x128xbf16> to vector<2x16x128xbf16>
      %33 = vector.extract_strided_slice %32 {offsets = [0, 0, 0], sizes = [1, 16, 128], strides = [1, 1, 1]} : vector<2x16x128xbf16> to vector<1x16x128xbf16>
      %c0_29 = arith.constant 0 : index
      %c1_30 = arith.constant 1 : index
      %c0_31 = arith.constant 0 : index
      %34 = vector.load %arg8[%c0_29, %c1_30, %c0_31] : memref<10x18x128xbf16, #tpu.memory_space<vmem>>, vector<1x16x128xbf16>
      tpu.vector_store %arg8[%c0_29, %c1_30, %c0_31], %33 {strides = array<i32>} : memref<10x18x128xbf16, #tpu.memory_space<vmem>>, vector<1x16x128xbf16>,
      %35 = vector.extract_strided_slice %32 {offsets = [1, 0, 0], sizes = [1, 16, 128], strides = [1, 1, 1]} : vector<2x16x128xbf16> to vector<1x16x128xbf16>
      %c9 = arith.constant 9 : index
      %c1_32 = arith.constant 1 : index
      %c0_33 = arith.constant 0 : index
      %36 = vector.load %arg8[%c9, %c1_32, %c0_33] : memref<10x18x128xbf16, #tpu.memory_space<vmem>>, vector<1x16x128xbf16>
      tpu.vector_store %arg8[%c9, %c1_32, %c0_33], %35 {strides = array<i32>} : memref<10x18x128xbf16, #tpu.memory_space<vmem>>, vector<1x16x128xbf16>,
      %c0_34 = arith.constant 0 : index
      %c0_35 = arith.constant 0 : index
      %c0_36 = arith.constant 0 : index
      %37 = vector.load %arg8[%c0_34, %c0_35, %c0_36] : memref<10x18x128xbf16, #tpu.memory_space<vmem>>, vector<10x16x128xbf16>
      %38 = vector.shape_cast %37 : vector<10x16x128xbf16> to vector<160x128xbf16>
      %39 = vector.extract_strided_slice %38 {offsets = [0, 0], sizes = [128, 128], strides = [1, 1]} : vector<160x128xbf16> to vector<128x128xbf16>
      %c0_37 = arith.constant 0 : index
      %c0_38 = arith.constant 0 : index
      %40 = vector.load %arg9[%c0_37, %c0_38] : memref<128x1152xbf16, #tpu.memory_space<vmem>>, vector<128x128xbf16>
      tpu.vector_store %arg9[%c0_37, %c0_38], %39 {strides = array<i32>} : memref<128x1152xbf16, #tpu.memory_space<vmem>>, vector<128x128xbf16>,
      %41 = vector.extract_strided_slice %38 {offsets = [16, 0], sizes = [128, 128], strides = [1, 1]} : vector<160x128xbf16> to vector<128x128xbf16>
      %c0_39 = arith.constant 0 : index
      %c384 = arith.constant 384 : index
      %42 = vector.load %arg9[%c0_39, %c384] : memref<128x1152xbf16, #tpu.memory_space<vmem>>, vector<128x128xbf16>
      tpu.vector_store %arg9[%c0_39, %c384], %41 {strides = array<i32>} : memref<128x1152xbf16, #tpu.memory_space<vmem>>, vector<128x128xbf16>,
      %43 = vector.extract_strided_slice %38 {offsets = [32, 0], sizes = [128, 128], strides = [1, 1]} : vector<160x128xbf16> to vector<128x128xbf16>
      %c0_40 = arith.constant 0 : index
      %c768 = arith.constant 768 : index
      %44 = vector.load %arg9[%c0_40, %c768] : memref<128x1152xbf16, #tpu.memory_space<vmem>>, vector<128x128xbf16>
      tpu.vector_store %arg9[%c0_40, %c768], %43 {strides = array<i32>} : memref<128x1152xbf16, #tpu.memory_space<vmem>>, vector<128x128xbf16>,
      %c0_41 = arith.constant 0 : index
      %c1_42 = arith.constant 1 : index
      %c0_43 = arith.constant 0 : index
      %45 = vector.load %arg8[%c0_41, %c1_42, %c0_43] : memref<10x18x128xbf16, #tpu.memory_space<vmem>>, vector<10x16x128xbf16>
      %46 = vector.shape_cast %45 : vector<10x16x128xbf16> to vector<160x128xbf16>
      %47 = vector.extract_strided_slice %46 {offsets = [0, 0], sizes = [128, 128], strides = [1, 1]} : vector<160x128xbf16> to vector<128x128xbf16>
      %c0_44 = arith.constant 0 : index
      %c128 = arith.constant 128 : index
      %48 = vector.load %arg9[%c0_44, %c128] : memref<128x1152xbf16, #tpu.memory_space<vmem>>, vector<128x128xbf16>
      tpu.vector_store %arg9[%c0_44, %c128], %47 {strides = array<i32>} : memref<128x1152xbf16, #tpu.memory_space<vmem>>, vector<128x128xbf16>,
      %49 = vector.extract_strided_slice %46 {offsets = [16, 0], sizes = [128, 128], strides = [1, 1]} : vector<160x128xbf16> to vector<128x128xbf16>
      %c0_45 = arith.constant 0 : index
      %c512 = arith.constant 512 : index
      %50 = vector.load %arg9[%c0_45, %c512] : memref<128x1152xbf16, #tpu.memory_space<vmem>>, vector<128x128xbf16>
      tpu.vector_store %arg9[%c0_45, %c512], %49 {strides = array<i32>} : memref<128x1152xbf16, #tpu.memory_space<vmem>>, vector<128x128xbf16>,
      %51 = vector.extract_strided_slice %46 {offsets = [32, 0], sizes = [128, 128], strides = [1, 1]} : vector<160x128xbf16> to vector<128x128xbf16>
      %c0_46 = arith.constant 0 : index
      %c896 = arith.constant 896 : index
      %52 = vector.load %arg9[%c0_46, %c896] : memref<128x1152xbf16, #tpu.memory_space<vmem>>, vector<128x128xbf16>
      tpu.vector_store %arg9[%c0_46, %c896], %51 {strides = array<i32>} : memref<128x1152xbf16, #tpu.memory_space<vmem>>, vector<128x128xbf16>,
      %c0_47 = arith.constant 0 : index
      %c2 = arith.constant 2 : index
      %c0_48 = arith.constant 0 : index
      %53 = vector.load %arg8[%c0_47, %c2, %c0_48] : memref<10x18x128xbf16, #tpu.memory_space<vmem>>, vector<10x16x128xbf16>
      %54 = vector.shape_cast %53 : vector<10x16x128xbf16> to vector<160x128xbf16>
      %55 = vector.extract_strided_slice %54 {offsets = [0, 0], sizes = [128, 128], strides = [1, 1]} : vector<160x128xbf16> to vector<128x128xbf16>
      %c0_49 = arith.constant 0 : index
      %c256 = arith.constant 256 : index
      %56 = vector.load %arg9[%c0_49, %c256] : memref<128x1152xbf16, #tpu.memory_space<vmem>>, vector<128x128xbf16>
      tpu.vector_store %arg9[%c0_49, %c256], %55 {strides = array<i32>} : memref<128x1152xbf16, #tpu.memory_space<vmem>>, vector<128x128xbf16>,
      %57 = vector.extract_strided_slice %54 {offsets = [16, 0], sizes = [128, 128], strides = [1, 1]} : vector<160x128xbf16> to vector<128x128xbf16>
      %c0_50 = arith.constant 0 : index
      %c640 = arith.constant 640 : index
      %58 = vector.load %arg9[%c0_50, %c640] : memref<128x1152xbf16, #tpu.memory_space<vmem>>, vector<128x128xbf16>
      tpu.vector_store %arg9[%c0_50, %c640], %57 {strides = array<i32>} : memref<128x1152xbf16, #tpu.memory_space<vmem>>, vector<128x128xbf16>,
      %59 = vector.extract_strided_slice %54 {offsets = [32, 0], sizes = [128, 128], strides = [1, 1]} : vector<160x128xbf16> to vector<128x128xbf16>
      %c0_51 = arith.constant 0 : index
      %c1024 = arith.constant 1024 : index
      %60 = vector.load %arg9[%c0_51, %c1024] : memref<128x1152xbf16, #tpu.memory_space<vmem>>, vector<128x128xbf16>
      tpu.vector_store %arg9[%c0_51, %c1024], %59 {strides = array<i32>} : memref<128x1152xbf16, #tpu.memory_space<vmem>>, vector<128x128xbf16>,
    } else {
    }
    %3 = arith.index_cast %arg2 : i32 to index
    %c0 = arith.constant 0 : index
    %c0_1 = arith.constant 0 : index
    %4 = vector.load %arg5[%3, %c0, %c0_1] : memref<1x1152x128xbf16, #tpu.memory_space<vmem>>, vector<1x1152x128xbf16>
    %5 = vector.shape_cast %4 : vector<1x1152x128xbf16> to vector<1152x128xbf16>
    %c0_2 = arith.constant 0 : index
    %c0_3 = arith.constant 0 : index
    %6 = vector.load %arg9[%c0_2, %c0_3] : memref<128x1152xbf16, #tpu.memory_space<vmem>>, vector<128x1152xbf16>
    %cst = arith.constant dense<0.000000e+00> : vector<128x128xf32>
    %7 = tpu.matmul %6, %5, %cst {dimension_numbers = #tpu.dot_dimension_numbers<[1], [0], [0], [1], [0, 0, 1, 1], [], []>} : vector<128x1152xbf16>, vector<1152x128xbf16>, vector<128x128xf32> -> vector<128x128xf32>
    %8 = arith.index_cast %arg2 : i32 to index
    %c0_4 = arith.constant 0 : index
    %c0_5 = arith.constant 0 : index
    %9 = vector.load %arg6[%8, %c0_4, %c0_5] : memref<1x1x128xf32, #tpu.memory_space<vmem>>, vector<1x1x128xf32>
    %10 = vector.shape_cast %9 : vector<1x1x128xf32> to vector<1x128xf32>
    %11 = vector.broadcast %10 : vector<1x128xf32> to vector<128x128xf32>
    %12 = arith.addf %7, %11 : vector<128x128xf32>
    %cst_6 = arith.constant 0.000000e+00 : f32
    %13 = vector.broadcast %cst_6 : f32 to vector<128x128xf32>
    %14 = arith.subf %13, %12 : vector<128x128xf32>
    %15 = math.exp %14 : vector<128x128xf32>
    %cst_7 = arith.constant 1.000000e+00 : f32
    %16 = vector.broadcast %cst_7 : f32 to vector<128x128xf32>
    %17 = arith.addf %16, %15 : vector<128x128xf32>
    %18 = tpu.reciprocal %17 {approx = true} : vector<128x128xf32> -> vector<128x128xf32>
    %19 = arith.mulf %12, %18 : vector<128x128xf32>
    %20 = vector.shape_cast %19 : vector<128x128xf32> to vector<8x16x128xf32>
    %21 = arith.truncf %20 : vector<8x16x128xf32> to vector<8x16x128xbf16>
    %c0_8 = arith.constant 0 : index
    %c0_9 = arith.constant 0 : index
    %c0_10 = arith.constant 0 : index
    %c0_11 = arith.constant 0 : index
    %22 = vector.load %arg7[%c0_8, %c0_9, %c0_10, %c0_11] : memref<1x8x16x128xbf16, #tpu.memory_space<vmem>>, vector<1x8x16x128xbf16>
    %23 = vector.shape_cast %22 : vector<1x8x16x128xbf16> to vector<8x16x128xbf16>
    %24 = vector.shape_cast %21 : vector<8x16x128xbf16> to vector<1x8x16x128xbf16>
    tpu.vector_store %arg7[%c0_8, %c0_9, %c0_10, %c0_11], %24 {strides = array<i32>} : memref<1x8x16x128xbf16, #tpu.memory_space<vmem>>, vector<1x8x16x128xbf16>,
    return
  }
  func.func @transform_0(%arg0: i32, %arg1: i32, %arg2: i32) -> (i32, i32, i32, i32) {
    %c0_i32 = arith.constant 0 : i32
    %c0_i32_0 = arith.constant 0 : i32
    %c0_i32_1 = arith.constant 0 : i32
    return %arg0, %arg1, %c0_i32, %c0_i32_0 : i32, i32, i32, i32
  }
  func.func @transform_1(%arg0: i32, %arg1: i32, %arg2: i32) -> (i32, i32, i32, i32, i32) {
    %c0_i32 = arith.constant 0 : i32
    %c0_i32_0 = arith.constant 0 : i32
    %c0_i32_1 = arith.constant 0 : i32
    %c0_i32_2 = arith.constant 0 : i32
    return %arg0, %arg1, %c0_i32, %c0_i32_0, %c0_i32_1 : i32, i32, i32, i32, i32
  }
  func.func @transform_2(%arg0: i32, %arg1: i32, %arg2: i32) -> (i32, i32, i32) {
    %c0_i32 = arith.constant 0 : i32
    %c0_i32_0 = arith.constant 0 : i32
    %c0_i32_1 = arith.constant 0 : i32
    %c0_i32_2 = arith.constant 0 : i32
    return %c0_i32, %c0_i32_0, %c0_i32_1 : i32, i32, i32
  }
  func.func @transform_3(%arg0: i32, %arg1: i32, %arg2: i32) -> (i32, i32, i32) {
    %c0_i32 = arith.constant 0 : i32
    %c0_i32_0 = arith.constant 0 : i32
    %c0_i32_1 = arith.constant 0 : i32
    %c0_i32_2 = arith.constant 0 : i32
    return %c0_i32, %c0_i32_0, %c0_i32_1 : i32, i32, i32
  }
  func.func @transform_4(%arg0: i32, %arg1: i32, %arg2: i32) -> (i32, i32, i32, i32) {
    %c0_i32 = arith.constant 0 : i32
    %c0_i32_0 = arith.constant 0 : i32
    return %arg0, %arg1, %c0_i32, %arg2 : i32, i32, i32, i32
  }
}

</mosaic_0001>

<bundles_post_ra>
// kernel: tpu_custom_call.1
= control target key start
LH: loop header
LB: loop body
LE: loop exit
PB: predicated region body
PF: predicated region fallthrough
CT: control target
= control target key end

     0   :  { %s4975_s0 = inlined_call_operand.hbm [shape: bf16[2,16,16,128], index: 0, kind: input, shape index: {}]   ;;  %s4976_s1 = inlined_call_operand.hbm [shape: bf16[2,2,2,16,128], index: 1, kind: input, shape index: {}]   ;;  %s4977_s2 = inlined_call_operand.hbm [shape: bf16[1,1152,128], index: 2, kind: input, shape index: {}]   ;;  %s4978_s3 = inlined_call_operand.vmem [shape: f32[1,1,128], index: 3, kind: input, shape index: {}]   ;;  %s4979_s4 = inlined_call_operand.hbm [shape: bf16[2,16,16,128], index: 4, kind: output, shape index: {}]  }
   0x1   :  { %4992 = sst [smem:[#allocation34_spill]] %s4975_s0 }
   0x2   :  { %4993 = sst [smem:[#allocation35_spill]] %s4977_s2 }
   0x3   :  { %4994 = sst [smem:[#allocation36_spill]] %s4979_s4 }
   0x4   :  { %9 = vsyncpa [#allocation5], 0 }
   0x5   :  { %11 = vsyncpa [#allocation5 + $0x1], 0 }
   0x6   :  { %12 = vsyncpa [#allocation8], 0 }
   0x7   :  { %14 = vsyncpa [#allocation8 + $0x1], 0 }
   0x8   :  { %15 = vsyncpa [#allocation6], 0 }
   0x9   :  { %17 = vsyncpa [#allocation6 + $0x1], 0  ;;  %s4267_s15 = smov 0   ;;  %s4269_s16 = smov 0  }
   0xa   :  { %s4271_s17 = smov 0   ;;  %s4273_s18 = smov 0  }
   0xb   :  { %s4275_s19 = smov 0   ;;  %s4277_s20 = smov 0  }
   0xc   :  { %s4279_s21 = smov 0   ;;  %s4281_s22 = smov 0  }
   0xd LB: > { %4995 = sst [smem:[#allocation15_spill]] %s4204_s15  ;;  %s4308_s23 = sadd.s32 4294967295, %s4232_s22   ;;  %s4232_s22 = sphi %s4281_s22, %s23_s22   ;;  %s4228_s21 = sphi %s4279_s21, %s5063_s21   ;;  %s4224_s20 = sphi %s4277_s20, %s5062_s20   ;;  %s4220_s19 = sphi %s4275_s19, %s5061_s19   ;;  %s4216_s18 = sphi %s4273_s18, %s5060_s18   ;;  %s4212_s17 = sphi %s4271_s17, %s5055_s17   ;;  %s4208_s16 = sphi %s4269_s16, %s5059_s16   ;;  %s4204_s15 = sphi %s4267_s15, %s5058_s15  }
   0xe   : > { %4996 = sst [smem:[#allocation16_spill]] %s4212_s17  ;;  %s3127_s24 = sadd.s32 4294967294, %s4232_s22  }
   0xf   : > { %p64_p0 = scmp.ne.s32.totalorder %s4208_s16, %s4204_s15  ;;  %p65_p1 = scmp.eq.s32.totalorder %s4308_s23, 0 }
  0x10   : > { %p168_p3 = scmp.eq.s32.totalorder %s3127_s24, 3  ;;  %p3128_p5 = scmp.ge.s32.totalorder %s4232_s22, 1 }
  0x11   : > { %p4317_p4 = por %p65_p1, %p64_p0  ;;  %p175_p7 = scmp.lt.s32.totalorder %s4232_s22, 5 }
  0x12   : > { %p4322_p6 = por %p168_p3, %p64_p0  ;;  %s4234_s28 = smov [#allocation9]  }
  0x13   : > { %p4327_p8 = pnand %p3128_p5, %p175_p7  ;;  %s187_s29 = sshll.u32 %s4234_s28, 4  ;;  %s188_s29 = int_to_ptr.vmem [resolvable:$true] %s187_s29 }
  0x14   : > { %s4998_s26 = scalar_select %p4322_p6, 1, 0 }
  0x15   : > { %p3718_p9 = pneg %p4327_p8  ;;  %s4057_s30 = scalar_lea.vmem %s188_s29, 9216 }
  0x16   : > { %4999 = sst [smem:[#allocation17_spill]] %s4998_s26  ;;  %p4058_p12 = scmp.ne.s32.totalorder %s188_s29, %s4057_s30 }
  0x17   : > { %p3719_p10 = pnand %p3718_p9, %p65_p1  ;;  %p4065_p3 = scmp.lt.s32.totalorder %s188_s29, %s188_s29 }
  0x18   : > { %p4066_p2 = scmp.lt.s32.totalorder %s4057_s30, %s4057_s30 }
  0x19   : > { %p4048_p11 = pneg %p3719_p10 }
  0x1a   : > { %p4067_p6 = por %p4066_p2, %p4065_p3 }
  0x1b   : > { %p4060_p13 = pnand %p4058_p12, %p4048_p11 }
  0x1d   : > { %p4061_p0 = pneg %p4060_p13 }
  0x1f   : > { %p4068_p5 = pnand %p4067_p6, %p4061_p0 }
  0x21   : > { %4071 = shalt.err (!%p4068_p5)
}
  0x22   : > { %s4980_s5 = smov 64   ;;  %s4982_s6 = smov 4  }
  0x23   : > { %s5001_s2 = sld [smem:[#allocation35_spill]]  ;;  %s38_s9 = sadd.s32 1, %s4224_s20 }
  0x24   : > { %p40_p2 = scmp.ge.s32.totalorder %s38_s9, 2  ;;  %s42_s10 = sadd.s32 1, %s4228_s21 }
  0x25   : > { %s51_s11 = sadd.s32 1, %s4212_s17  ;;  %p58_p6 = scmp.ne.s32.totalorder %s4212_s17, %s4208_s16 }
  0x26   : > { %s5065_s9 = smov (%p40_p2, %s38_s9), 0  ;;  %s5067_s10 = smov (!%p40_p2, %s42_s10), %s4228_s21 }
  0x27   : > { %5002 = sst [smem:[#allocation18_spill]] %s5065_s9  ;;  %s47_s12 = ssub.s32 %s4224_s20, %s5065_s9 }
  0x28   : > { %p59_p7 = scmp.eq.s32.totalorder %s4232_s22, 0  ;;  %p44_p9 = scmp.ge.s32.totalorder %s5067_s10, 2 }
  0x29   : > { %3721 = dma.hbm_to_vmem [thread:$0]  (!%p3719_p10), %s5001_s2, 9216, %s188_s29, [#allocation8], %s4980_s5, %s4980_s5, %s4982_s6  }
  0x2a   : > { %p5003_p11 = scmp.eq.s32.totalorder %s4308_s23, 3  ;;  %p4358_p10 = por %p59_p7, %p58_p6 }
  0x2b   : > { %p3734_p13 = scmp.lt.s32.totalorder %s4232_s22, 4  ;;  %s5069_s10 = smov (%p44_p9, %s5067_s10), 0 }
  0x2c   : > { %p4354_p12 = por %p5003_p11, %p58_p6  ;;  %5007 = sst [smem:[#allocation20_spill]] %s5069_s10 }
  0x2d   : > { %s4366_s24 = sand.u32 1, %s4212_s17   ;;  %s3323_s28 = sshll.u32 %s4224_s20, 4 }
  0x2e   : > { %s5004_s13 = scalar_select %p4354_p12, 1, 0 }
  0x2f   : > { %s46_s29 = ssub.s32 %s4228_s21, %s5069_s10  ;;  %s3131_s7 = sshll.u32 %s4366_s24, 6 }
  0x30   : > { %5005 = sst [smem:[#allocation19_spill]] %s5004_s13  ;;  %s48_s30 = sor.u32 %s47_s12, %s46_s29 }
  0x31   : > { %p49_p0 = scmp.eq.s32.totalorder %s48_s30, 0  ;;  %s3134_s8 = sshll.u32 %s4228_s21, 5 }
  0x32   : > { %s208_s5 = scalar_lea.vmem [#allocation4], %s3131_s7  ;;  %s215_s9 = sadd.s32 %s3323_s28, %s3134_s8 }
  0x33   : > { %s218_s6 = sshll.u32 %s208_s5, 4  ;;  %s3135_s26 = sshll.u32 %s215_s9, 6  ;;  %s219_s6 = int_to_ptr.vmem [resolvable:$true] %s218_s6 }
  0x34   : > { %s4374_s2 = scalar_select %p49_p0, %s4212_s17, %s51_s11  }
  0x35   : > { %p4380_p3 = pnand %p3734_p13, %p4358_p10  ;;  %s5010_s0 = sld [smem:[#allocation34_spill]] }
  0x36   : > { %5008 = sst [smem:[#allocation21_spill]] %s4374_s2  ;;  %s228_s29 = sand.u32 1, %s4232_s22  }
  0x37   : > { %s205_s30 = scalar_lea.sflag [#allocation5], %s4366_s24  ;;  %p4074_p5 = pneg %p4380_p3 }
  0x38   : > { %s4085_s5 = scalar_lea.vmem %s219_s6, 1024  ;;  %s4237_s9 = smov [#allocation4]  }
  0x39   : > { %p4086_p2 = scmp.ne.s32.totalorder %s219_s6, %s4085_s5  ;;  %s4090_s11 = sshll.u32 %s4237_s9, 4  ;;  %s4091_s11 = int_to_ptr.vmem [resolvable:$false] %s4090_s11 }
  0x3a   : > { %s4092_s14 = scalar_lea.vmem %s4091_s11, 2048  ;;  %p4093_p9 = scmp.lt.s32.totalorder %s219_s6, %s4091_s11 }
  0x3b   : > { %s217_s12 = scalar_lea.hbm %s5010_s0, %s3135_s26  ;;  %p4088_p6 = pnand %p4086_p2, %p4074_p5 }
  0x3c   : > { %p4094_p11 = scmp.lt.s32.totalorder %s4092_s14, %s4085_s5 }
  0x3d   : > { %p4089_p7 = pneg %p4088_p6 }
  0x3e   : > { %p4095_p10 = por %p4094_p11, %p4093_p9 }
  0x40   : > { %p4096_p13 = pnand %p4095_p10, %p4089_p7 }
  0x42   : > { %4099 = shalt.err (!%p4096_p13)
}
  0x43   : > { %s5011_s4 = smov 4   ;;  %s5012_s26 = smov 64  }
  0x44   : > { %3725 = dma.hbm_to_vmem [thread:$0]  (!%p4380_p3), %s217_s12, 1024, %s219_s6, %s205_s30, %s5012_s26, %s5012_s26, %s5011_s4  }
  0x45   : > { %s3136_s13 = sshll.u32 %s4366_s24, 4  ;;  %s3137_s28 = sshll.u32 %s4224_s20, 2 }
  0x46   : > { %s3138_s7 = sshll.u32 %s4228_s21, 3  ;;  %s232_s9 = scalar_lea.vmem [#allocation7], %s3136_s13 }
  0x47   : > { %s238_s8 = sadd.s32 %s3138_s7, %s3137_s28  ;;  %s241_s11 = sshll.u32 %s232_s9, 4  ;;  %s242_s11 = int_to_ptr.vmem [resolvable:$true] %s241_s11 }
  0x48   : > { %s3139_s5 = sshll.u32 %s238_s8, 6  ;;  %s229_s2 = scalar_lea.sflag [#allocation8], %s228_s29 }
  0x49   : > { %s240_s10 = scalar_lea.hbm %s4976_s1, %s3139_s5  ;;  %s4113_s17 = scalar_lea.vmem %s242_s11, 256 }
  0x4a   : > { %p4114_p0 = scmp.ne.s32.totalorder %s242_s11, %s4113_s17  ;;  %s4238_s6 = smov [#allocation7]  }
  0x4b   : > { %s4118_s24 = sshll.u32 %s4238_s6, 4  ;;  %s4119_s24 = int_to_ptr.vmem [resolvable:$false] %s4118_s24 }
  0x4c   : > { %p4116_p2 = pnand %p4114_p0, %p4074_p5  ;;  %s4120_s12 = scalar_lea.vmem %s4119_s24, 512 }
  0x4d   : > { %p4121_p7 = scmp.lt.s32.totalorder %s242_s11, %s4119_s24  ;;  %p4122_p9 = scmp.lt.s32.totalorder %s4120_s12, %s4113_s17 }
  0x4e   : > { %p4117_p6 = pneg %p4116_p2 }
  0x4f   : > { %p4123_p11 = por %p4122_p9, %p4121_p7 }
  0x51   : > { %p4124_p10 = pnand %p4123_p11, %p4117_p6 }
  0x53   : > { %4127 = shalt.err (!%p4124_p10)
}
  0x54   : > { %3728 = dma.hbm_to_vmem [thread:$0]  (!%p4380_p3), %s240_s10, 256, %s242_s11, %s229_s2, %s5012_s26, %s5012_s26, %s5011_s4  }
  0x55   : > { %253 = sbr.rel (%p4327_p8) target bundleno = 611 (0x263), region = 36 }
  0x5a   : > { %s4416_s0 = sand.u32 1, %s4208_s16  }
  0x5b   : > { %s3141_s17 = sshll.u32 %s4416_s0, 6  ;;  %s256_s29 = scalar_lea.sflag [#allocation5], %s4416_s0 }
  0x5c   : > { %s4422_s30 = scalar_lea.vmem [#allocation4], %s3141_s17 }
  0x5d   : > { %4187 = dma.done.wait (%p4317_p4), %s256_s29, 1024  }
  0x5e   : > { %4189 = vsyncadd (%p4317_p4), %s256_s29, 4294966272  ;;  %s264_s2 = sand.u32 1, %s4308_s23   ;;  %s3142_s15 = sshll.u32 %s4416_s0, 4 }
  0x5f   : > { %s265_s27 = scalar_lea.sflag [#allocation8], %s264_s2  ;;  %s4430_s10 = scalar_lea.vmem [#allocation7], %s3142_s15 }
  0x60   : > { %4191 = dma.done.wait (%p4317_p4), %s265_s27, 256  }
  0x61   : > { %4193 = vsyncadd (%p4317_p4), %s265_s27, 4294967040 }
  0x62   : > { %4195 = dma.done.wait (%p65_p1), [#allocation8], 9216  }
  0x63   : > { %4197 = vsyncadd (%p65_p1), [#allocation8], 4294958080  ;;  %v3806_v0 = vld [vmem:[#allocation9 + $0xf8] sm:$0xff]   ;;  %v3810_v4 = vld [vmem:[#allocation9 + $0xf0] sm:$0xff]   ;;  %vm310_vm0 = vsmask.f32 256 }
  0x64   : > { %v3807_v1 = vld [vmem:[#allocation9 + $0xb8] sm:$0xff]   ;;  %3452 = vmatprep.subr.bf16.mxu1 %v3806_v0  ;;  %v3811_v5 = vld [vmem:[#allocation9 + $0xb0] sm:$0xff]   ;;  %v3814_v8 = vld [vmem:[#allocation9 + $0xe8] sm:$0xff]   ;;  %vm342_vm1 = vsmask.f32 7938  ;;  %vm309_vm2 = vcmask 1040384  }
  0x65   : > { %v3808_v2 = vld [vmem:[#allocation9 + $0x78] sm:$0xff]   ;;  %3453 = vmatpush3.bf16.msra.mxu1 %v3807_v1  ;;  %v3812_v6 = vld [vmem:[#allocation9 + $0x70] sm:$0xff]   ;;  %v3815_v9 = vld [vmem:[#allocation9 + $0xa8] sm:$0xff]   ;;  %vm390_vm5 = vsmask.f32 4368  ;;  %vm553_vm6 = vcmask 1043456  }
  0x66   : > { %v3809_v3 = vld [vmem:[#allocation9 + $0x38] sm:$0xff]   ;;  %3388 = vmatprep.subr.bf16.mxu0 %v3808_v2  ;;  %3454 = vmatprep.subr.bf16.mxu1 %v3810_v4  ;;  %v3813_v7 = vld [vmem:[#allocation9 + $0x30] sm:$0xff]   ;;  %v3816_v10 = vld [vmem:[#allocation9 + $0x68] sm:$0xff]   ;;  %vm1139_vm9 = vcmask 1042432   ;;  %vm1140_vm10 = vcmask 1046532   ;;  %s4894_s4 = scalar_lea.vmem [#allocation10], %s3141_s17 }
  0x67   : > { %3389 = vmatpush3.bf16.msra.mxu0 %v3809_v3  ;;  %v3817_v11 = vld [vmem:[#allocation9 + $0x28] sm:$0xff]   ;;  %v3818_v12 = vld [vmem:[#allocation9 + $0xe0] sm:$0xff]   ;;  %v3822_v16 = vld [vmem:[#allocation9 + $0xd8] sm:$0xff]   ;;  %vm768_vm11 = vsmask.f32 3328  ;;  %s3340_s26 = sshll.u32 %s4216_s18, 4 }
  0x68   : > { %3390 = vmatprep.subr.bf16.mxu0 %v3812_v6  ;;  %v3819_v13 = vld [vmem:[#allocation9 + $0xa0] sm:$0xff]   ;;  %v3823_v17 = vld [vmem:[#allocation9 + $0x98] sm:$0xff]   ;;  %v3826_v20 = vld [vmem:[#allocation9 + $0xd0] sm:$0xff]   ;;  %vm769_vm12 = vsmask.f32 7440  ;;  %s3319_s13 = sshll.u32 %s4220_s19, 5 }
  0x69   : > { %3455 = vmatpush3.bf16.msra.mxu1 %v3811_v5  ;;  %v3820_v14 = vld [vmem:[#allocation9 + $0x60] sm:$0xff]   ;;  %v3824_v18 = vld [vmem:[#allocation9 + $0x58] sm:$0xff]   ;;  %v3827_v21 = vld [vmem:[#allocation9 + $0x90] sm:$0xff]   ;;  %s2991_s28 = sadd.s32 %s3340_s26, %s3319_s13  ;;  %s2994_s19 = sshll.u32 %s4894_s4, 4  ;;  %s4920_s19 = int_to_ptr.vmem [resolvable:$true] %s2994_s19 }
  0x6a   : > { %3456 = vmatprep.subr.bf16.mxu1 %v3814_v8  ;;  %v3821_v15 = vld [vmem:[#allocation9 + $0x20] sm:$0xff]   ;;  %v3825_v19 = vld [vmem:[#allocation9 + $0x18] sm:$0xff]   ;;  %vm4441_vm3 = vmand %vm309_vm2, %vm310_vm0  ;;  %s3320_s18 = sshll.u32 %s2991_s28, 6  ;;  %s5050_s11 = sld [smem:[#allocation36_spill]] }
  0x6b   : > { %3391 = vmatpush3.bf16.msra.mxu0 %v3813_v7  ;;  %vm4446_vm4 = vmand %vm309_vm2, %vm342_vm1  ;;  %v3828_v24 = vld [vmem:[#allocation9 + $0x50] sm:$0xff]   ;;  %v3830_v26 = vld [vmem:[#allocation9 + $0xc8] sm:$0xff]   ;;  %s2977_s14 = scalar_lea.sflag [#allocation6], %s4416_s0  ;;  %s4128_s6 = scalar_lea.vmem %s4920_s19, 1024 }
  0x6c   : > { %3392 = vmatprep.subr.bf16.mxu0 %v3816_v10  ;;  %v3829_v25 = vld [vmem:[#allocation9 + $0x10] sm:$0xff]   ;;  %v3831_v27 = vld [vmem:[#allocation9 + $0x88] sm:$0xff]   ;;  %v3834_v30 = vld [vmem:[#allocation9 + $0xc0] sm:$0xff]   ;;  %p4129_p1 = scmp.ne.s32.totalorder %s4920_s19, %s4128_s6  ;;  %s4239_s24 = smov [#allocation10]  }
  0x6d   : > { %3457 = vmatpush3.bf16.msra.mxu1 %v3815_v9  ;;  %v3832_v28 = vld [vmem:[#allocation9 + $0x48] sm:$0xff]   ;;  %v3835_v31 = vld [vmem:[#allocation9 + $0x80] sm:$0xff]   ;;  %v315_v34 = vld [vmem:[#allocation2 + $0xc] sm:$0x1]  ;;  %s4132_s12 = sshll.u32 %s4239_s24, 4  ;;  %s4133_s12 = int_to_ptr.vmem [resolvable:$false] %s4132_s12 }
  0x6e   : > { %3458 = vmatprep.subr.bf16.mxu1 %v3818_v12  ;;  %v3833_v29 = vld [vmem:[#allocation9 + $0x8] sm:$0xff]   ;;  %v3836_v32 = vld [vmem:[#allocation9 + $0x40] sm:$0xff]   ;;  %v344_v35 = vld [vmem:[#allocation2 + $0x8] sm:$0x1]  ;;  %v316_v37 = vsel %vm4441_vm3, 0, %v315_v34  ;;  %p4130_p4 = pnand %p4129_p1, %p4354_p12  ;;  %s4134_s17 = scalar_lea.vmem %s4133_s12, 2048 }
  0x6f   : > { %3393 = vmatpush3.bf16.msra.mxu0 %v3817_v11  ;;  %v312_v33 = vld [vmem:[#allocation2] sm:$0x1]  ;;  %v345_v38 = vsel %vm4446_vm4, 0, %v344_v35  ;;  %v347_v39 = vld [vmem:[#allocation2 + $0x14] sm:$0x1]  ;;  %v3840_v40 = vld [vmem:[#allocation9] sm:$0xff]   ;;  %p4135_p3 = scmp.lt.s32.totalorder %s4920_s19, %s4133_s12  ;;  %p4136_p5 = scmp.lt.s32.totalorder %s4134_s17, %s4128_s6 }
  0x70   : > { %3394 = vmatprep.subr.bf16.mxu0 %v3820_v14  ;;  %v313_v36 = vsel %vm4441_vm3, 0, %v312_v33  ;;  %317 = vst [vmem:[#allocation2 + $0xc] sm:$0x1] %v316_v37  ;;  %346 = vst [vmem:[#allocation2 + $0x8] sm:$0x1] %v345_v38  ;;  %v348_v41 = vsel %vm4446_vm4, 0, %v347_v39  ;;  %s4918_s5 = scalar_lea.hbm %s5050_s11, %s3320_s18  ;;  %p4131_p8 = pneg %p4130_p4 }
  0x71   : > { %3459 = vmatpush3.bf16.msra.mxu1 %v3819_v13  ;;  %314 = vst [vmem:[#allocation2] sm:$0x1] %v313_v36  ;;  %v374_v42 = vld [vmem:[%s4422_s30] sm:$0xf]  ;;  %v375_v43 = vld [vmem:[%s4422_s30 + $0x4] sm:$0xf]  ;;  %vm4464_vm7 = vmand %vm553_vm6, %vm342_vm1  ;;  %p4137_p13 = por %p4136_p5, %p4135_p3 }
  0x72   : > { %3460 = vmatprep.subr.bf16.mxu1 %v3822_v16  ;;  %v3844_v44 = vld [vmem:[#allocation9 + $0x178] sm:$0xff]   ;;  %349 = vst [vmem:[#allocation2 + $0x14] sm:$0x1] %v348_v41  ;;  %v393_v45 = vshrl.u32 %v374_v42, 16  ;;  %v396_v46 = vshll.u32 %v374_v42, 16  ;;  %v401_v47 = vshrl.u32 %v375_v43, 16  ;;  %vm4470_vm8 = vmor %vm310_vm0, %vm390_vm5 }
  0x73   : > { %3395 = vmatpush3.bf16.msra.mxu0 %v3821_v15  ;;  %v404_v48 = vshll.u32 %v375_v43, 16  ;;  %v611_v49 = vld [vmem:[%s4430_s10] sm:$0xf]  ;;  %v612_v50 = vld [vmem:[%s4430_s10 + $0x4] sm:$0xf]  ;;  %v3845_v58 = vld [vmem:[#allocation9 + $0x1f8] sm:$0xff]   ;;  %p4138_p0 = pnand %p4137_p13, %p4131_p8 }
  0x74   : > { %3396 = vmatprep.subr.bf16.mxu0 %v3824_v18  ;;  %v616_v51 = vshrl.u32 %v611_v49, 16  ;;  %v619_v52 = vshll.u32 %v611_v49, 16  ;;  %v395_v53 = vrot.slane %v393_v45, 7  ;;  %v403_v54 = vrot.slane %v401_v47, 7  ;;  %v318_v14 = vld [vmem:[#allocation2 + $0x18] sm:$0x1]  ;;  %vm4495_vm13 = vmor %vm1139_vm9, %vm1140_vm10 }
  0x75   : > { %3461 = vmatpush3.bf16.msra.mxu1 %v3823_v17  ;;  %v624_v55 = vshrl.u32 %v612_v50, 16  ;;  %v627_v56 = vshll.u32 %v612_v50, 16  ;;  %v319_v17 = vsel %vm4441_vm3, 0, %v318_v14  ;;  %v376_v18 = vld [vmem:[%s4422_s30 + $0x8] sm:$0xf]  ;;  %vm4510_vm14 = vmor %vm768_vm11, %vm769_vm12 }
  0x76   : > { %3462 = vmatprep.subr.bf16.mxu1 %v3826_v20  ;;  %v618_v57 = vrot.slane %v616_v51, 7  ;;  %v398_v59 = vor.u32 %v396_v46, %v395_v53  ;;  %v399_v60 = vrot.slane %v395_v53, 4  ;;  %v406_v61 = vor.u32 %v404_v48, %v403_v54  ;;  %320 = vst [vmem:[#allocation2 + $0x18] sm:$0x1] %v319_v17  ;;  %v350_v14 = vld [vmem:[#allocation2 + $0x20] sm:$0x1] }
  0x77   : > { %3397 = vmatpush3.bf16.msra.mxu0 %v3825_v19  ;;  %v408_v62 = vrot.slane %v403_v54, 4  ;;  %v626_v3 = vrot.slane %v624_v55, 7  ;;  %v555_v5 = vld [vmem:[#allocation2 + $0xc] sm:$0xf]  ;;  %v639_v7 = vld [vmem:[#allocation2 + $0x8] sm:$0x1] }
  0x78   : > { %3398 = vmatprep.subr.bf16.mxu0 %v3828_v24  ;;  %v621_v1 = vor.u32 %v619_v52, %v618_v57  ;;  %v622_v2 = vrot.slane %v618_v57, 4  ;;  %v407_v4 = vsel %vm4470_vm8, %v399_v60, %v406_v61  ;;  %v635_v6 = vld [vmem:[#allocation2] sm:$0xf]  ;;  %v556_v8 = vsel %vm4464_vm7, %v398_v59, %v555_v5  ;;  %v377_v19 = vld [vmem:[%s4422_s30 + $0xc] sm:$0xf] }
  0x79   : > { %3463 = vmatpush3.bf16.msra.mxu1 %v3827_v21  ;;  %558 = vst [vmem:[#allocation2 + $0x10] sm:$0xf] %v407_v4  ;;  %v559_v9 = vld [vmem:[#allocation2 + $0x14] sm:$0x1]  ;;  %v629_v10 = vor.u32 %v627_v56, %v626_v3  ;;  %v631_v11 = vrot.slane %v626_v3, 4  ;;  %v410_v20 = vshrl.u32 %v376_v18, 16 }
  0x7a   : > { %3464 = vmatprep.subr.bf16.mxu1 %v3830_v26  ;;  %v636_v12 = vsel %vm4464_vm7, %v621_v1, %v635_v6  ;;  %557 = vst [vmem:[#allocation2 + $0xc] sm:$0xf] %v556_v8  ;;  %v560_v13 = vsel %vm4441_vm3, %v408_v62, %v559_v9  ;;  %v413_v21 = vshll.u32 %v376_v18, 16  ;;  %v418_v24 = vshrl.u32 %v377_v19, 16 }
  0x7b   : > { %3399 = vmatpush3.bf16.msra.mxu0 %v3829_v25  ;;  %637 = vst [vmem:[#allocation2] sm:$0xf] %v636_v12  ;;  %v630_v15 = vsel %vm4470_vm8, %v622_v2, %v629_v10  ;;  %v640_v16 = vsel %vm4441_vm3, %v631_v11, %v639_v7  ;;  %561 = vst [vmem:[#allocation2 + $0x14] sm:$0x1] %v560_v13  ;;  %v421_v25 = vshll.u32 %v377_v19, 16  ;;  %v412_v26 = vrot.slane %v410_v20, 7 }
  0x7c   : > { %3400 = vmatprep.subr.bf16.mxu0 %v3832_v28  ;;  %638 = vst [vmem:[#allocation2 + $0x4] sm:$0xf] %v630_v15  ;;  %641 = vst [vmem:[#allocation2 + $0x8] sm:$0x1] %v640_v16  ;;  %v321_v13 = vld [vmem:[#allocation2 + $0x24] sm:$0x1] }
  0x7d   : > { %3465 = vmatpush3.bf16.msra.mxu1 %v3831_v27  ;;  %v4490_v27 = vrot.slane %v418_v24, 7  ;;  %v415_v35 = vor.u32 %v413_v21, %v412_v26  ;;  %v562_v54 = vld [vmem:[#allocation2 + $0x18] sm:$0xf] }
  0x7e   : > { %3466 = vmatprep.subr.bf16.mxu1 %v3834_v30 }
  0x7f   : > { %3401 = vmatpush3.bf16.msra.mxu0 %v3833_v29  ;;  %v416_v29 = vrot.slane %v412_v26, 4  ;;  %v423_v30 = vor.u32 %v421_v25, %v4490_v27 }
  0x80   : > { %3402 = vmatprep.subr.bf16.mxu0 %v3836_v32  ;;  %v673_v28 = vld [vmem:[#allocation2 + $0x10] sm:$0xf] }
  0x81   : > { %3467 = vmatpush3.bf16.msra.mxu1 %v3835_v31  ;;  %v1083_v31 = vld [vmem:[#allocation2 + $0x10] sm:$0xf]  ;;  %v672_v32 = vld [vmem:[#allocation2 + $0xc] sm:$0xf]  ;;  %693 = vst [vmem:[#allocation3 + $0x6c] sm:$0xf] %v673_v28  ;;  %v424_v39 = vsel %vm4470_vm8, %v416_v29, %v423_v30 }
  0x82   : > { %3580 = vmatprep.subr.bf16.mxu1 %v3845_v58  ;;  %707 = vst [vmem:[#allocation3 + $0x30] sm:$0xf] %v673_v28  ;;  %v1079_v33 = vld [vmem:[#allocation2] sm:$0xe]  ;;  %692 = vst [vmem:[#allocation3 + $0x48] sm:$0xf] %v672_v32  ;;  %v563_v58 = vsel %vm4464_vm7, %v415_v35, %v562_v54 }
  0x83   : > { %3403 = vmatpush3.bf16.msra.mxu0 %v3840_v40  ;;  %v670_v34 = vld [vmem:[#allocation2] sm:$0xf]  ;;  %706 = vst [vmem:[#allocation3 + $0xc] sm:$0xf] %v672_v32  ;;  %v3145_v37 = vrot.slane %v1079_v33, 9  ;;  %v425_v40 = vrot.slane %v4490_v27, 4 }
  0x84   : > { %3516 = vmatprep.subr.bf16.mxu0 %v3844_v44  ;;  %690 = vst [vmem:[#allocation3] sm:$0xf] %v670_v34  ;;  %v738_v38 = vld [vmem:[#allocation2] sm:$0xf]  ;;  %v1151_v41 = vrot.slane %v1083_v31, 5 }
  0x85   : > { %v1080_v42 = vld [vmem:[#allocation2 + $0x4] sm:$0xf]  ;;  %v1081_v43 = vld [vmem:[#allocation2 + $0x8] sm:$0x1]  ;;  %565 = vst [vmem:[#allocation2 + $0x1c] sm:$0xf] %v424_v39 }
  0x86   : > { %v671_v44 = vld [vmem:[#allocation2 + $0x4] sm:$0xf]  ;;  %v1082_v45 = vld [vmem:[#allocation2 + $0xc] sm:$0xe]  ;;  %v1144_v46 = vrot.slane %v1080_v42, 5  ;;  %v1147_v47 = vrot.slane %v1081_v43, 5 }
  0x87   : > { %691 = vst [vmem:[#allocation3 + $0x24] sm:$0xf] %v671_v44  ;;  %v739_v48 = vld [vmem:[#allocation2 + $0x4] sm:$0xf]  ;;  %v740_v49 = vld [vmem:[#allocation2 + $0x8] sm:$0x1] }
  0x88   : > { %v772_v50 = vshrl.u32 %v738_v38, 16  ;;  %v775_v51 = vshll.u32 %v738_v38, 16  ;;  %v781_v52 = vshll.u32 %v739_v48, 16  ;;  %v785_v53 = vshrl.u32 %v739_v48, 16  ;;  %v1084_v59 = vld [vmem:[#allocation2 + $0x14] sm:$0x1] }
  0x89   : > { %v1145_v55 = vsel %vm4495_vm13, %v3145_v37, %v1144_v46  ;;  %v1146_v56 = vrot.slane %v1144_v46, 4  ;;  %v791_v57 = vshll.u32 %v740_v49, 16  ;;  %v741_v60 = vld [vmem:[#allocation2 + $0xc] sm:$0xf]  ;;  %564 = vst [vmem:[#allocation2 + $0x18] sm:$0xf] %v563_v58 }
  0x8a   : > { %1232 = vst [vmem:[#allocation3 + $0x8] sm:$0xf] %v1145_v55  ;;  %v774_v61 = vrot.slane %v772_v50, 4  ;;  %v777_v62 = vrot.slane %v775_v51, 5  ;;  %v783_v1 = vrot.slane %v781_v52, 5  ;;  %v787_v2 = vrot.slane %v785_v53, 4 }
  0x8b   : > { %v742_v3 = vld [vmem:[#allocation2 + $0x10] sm:$0xf]  ;;  %v1148_v4 = vsel %vm4495_vm13, %v1146_v56, %v1147_v47  ;;  %v793_v5 = vrot.slane %v791_v57, 5  ;;  %v3146_v6 = vrot.slane %v1082_v45, 9  ;;  %v1153_v7 = vrot.slane %v1151_v41, 4  ;;  %v3854_v47 = vld [vmem:[#allocation9 + $0x1f0] sm:$0xff]  }
  0x8c   : > { %v743_v8 = vld [vmem:[#allocation2 + $0x14] sm:$0x1]  ;;  %1233 = vst [vmem:[#allocation3 + $0x2c] sm:$0xf] %v1148_v4  ;;  %v778_v9 = vor.u32 %v777_v62, %v774_v61  ;;  %v788_v10 = vor.u32 %v787_v2, %v783_v1  ;;  %v1154_v11 = vrot.slane %v1084_v59, 5  ;;  %v796_v12 = vshrl.u32 %v741_v60, 16 }
  0x8d   : > { %v675_v16 = vld [vmem:[#allocation2 + $0x1c] sm:$0xf]  ;;  %v1152_v17 = vsel %vm4495_vm13, %v3146_v6, %v1151_v41  ;;  %v799_v18 = vshll.u32 %v741_v60, 16  ;;  %v805_v19 = vshll.u32 %v742_v3, 16  ;;  %v809_v20 = vshrl.u32 %v742_v3, 16  ;;  %v3847_v39 = vld [vmem:[#allocation9 + $0x1b8] sm:$0xff]  }
  0x8e   : > { %v779_v21 = vrot.slane %v778_v9, 4  ;;  %v789_v24 = vrot.slane %v788_v10, 4  ;;  %709 = vst [vmem:[#allocation3 + $0x78] sm:$0xf] %v675_v16  ;;  %v1155_v25 = vsel %vm4495_vm13, %v1153_v7, %v1154_v11  ;;  %1234 = vst [vmem:[#allocation3 + $0x50] sm:$0xf] %v1152_v17 }
  0x8f   : > { %695 = vst [vmem:[#allocation3 + $0xb4] sm:$0xf] %v675_v16  ;;  %723 = vst [vmem:[#allocation3 + $0x3c] sm:$0xf] %v675_v16  ;;  %v798_v26 = vrot.slane %v796_v12, 4  ;;  %v801_v29 = vrot.slane %v799_v18, 5 }
  0x90   : > { %1248 = vst [vmem:[#allocation3 + $0x14] sm:$0xf] %v1152_v17  ;;  %v378_v28 = vld [vmem:[%s4422_s30 + $0x10] sm:$0xf]  ;;  %1235 = vst [vmem:[#allocation3 + $0x74] sm:$0xf] %v1155_v25  ;;  %v784_v34 = vsel %vm4510_vm14, %v779_v21, %v783_v1  ;;  %v794_v35 = vsel %vm4510_vm14, %v789_v24, %v793_v5 }
  0x91   : > { %1249 = vst [vmem:[#allocation3 + $0x38] sm:$0xf] %v1155_v25  ;;  %v807_v30 = vrot.slane %v805_v19, 5  ;;  %v811_v31 = vrot.slane %v809_v20, 4  ;;  %v815_v32 = vshll.u32 %v743_v8, 16  ;;  %v322_v37 = vsel %vm4441_vm3, 0, %v321_v13 }
  0x92   : > { %v379_v33 = vld [vmem:[%s4422_s30 + $0x14] sm:$0xf]  ;;  %v351_v38 = vsel %vm4446_vm4, 0, %v350_v14  ;;  %1031 = vst [vmem:[#allocation3 + $0x4] sm:$0xf] %v784_v34  ;;  %v802_v42 = vor.u32 %v801_v29, %v798_v26  ;;  %v427_v44 = vshrl.u32 %v378_v28, 16 }
  0x93   : > { %1032 = vst [vmem:[#allocation3 + $0x28] sm:$0xf] %v794_v35  ;;  %v674_v41 = vld [vmem:[#allocation2 + $0x18] sm:$0xf]  ;;  %v812_v43 = vor.u32 %v811_v31, %v807_v30  ;;  %323 = vst [vmem:[#allocation2 + $0x24] sm:$0x1] %v322_v37 }
  0x94   : > { %352 = vst [vmem:[#allocation2 + $0x20] sm:$0x1] %v351_v38  ;;  %v4528_v45 = vld [vmem:[#allocation2 + $0x1c] sm:$0xf]  ;;  %708 = vst [vmem:[#allocation3 + $0x54] sm:$0xf] %v674_v41 }
  0x95   : > { %694 = vst [vmem:[#allocation3 + $0x90] sm:$0xf] %v674_v41  ;;  %722 = vst [vmem:[#allocation3 + $0x18] sm:$0xf] %v674_v41  ;;  %v817_v46 = vrot.slane %v815_v32, 5  ;;  %v430_v48 = vshll.u32 %v378_v28, 16 }
  0x96   : > { %v435_v49 = vshrl.u32 %v379_v33, 16  ;;  %v438_v50 = vshll.u32 %v379_v33, 16  ;;  %v1085_v51 = vld [vmem:[#allocation2 + $0x18] sm:$0xe]  ;;  %v3837_v52 = vld [vmem:[#allocation3 + $0x8] ss:$36 sps:$4 sm:$0xff]  }
  0x97   : > { %v3839_v53 = vld [vmem:[#allocation3 + $0xc] ss:$36 sps:$4 sm:$0xff]   ;;  %v803_v54 = vrot.slane %v802_v42, 4  ;;  %v745_v55 = vld [vmem:[#allocation2 + $0x1c] sm:$0xf]  ;;  %v813_v56 = vrot.slane %v812_v43, 4 }
  0x98   : > { %v429_v57 = vrot.slane %v427_v44, 7  ;;  %v4530_v58 = vrot.slane %v435_v49, 7  ;;  %v3147_v59 = vrot.slane %v1085_v51, 9  ;;  %v744_v60 = vld [vmem:[#allocation2 + $0x18] sm:$0xf]  ;;  %2444 = vmatprep.mubr.bf16.mxu1 %v3839_v53  ;;  %v1158_v62 = vrot.slane %v4528_v45, 5 }
  0x99   : > { %v808_v61 = vsel %vm4510_vm14, %v803_v54, %v807_v30  ;;  %v820_v1 = vshrl.u32 %v744_v60, 16  ;;  %v823_v2 = vshll.u32 %v744_v60, 16  ;;  %2445 = vmatmul.mubr.bf16.vlgmr.msra.gmra.mxu1 %v3837_v52  ;;  %v818_v3 = vsel %vm4510_vm14, %v813_v56, %v817_v46  ;;  %v3846_v6 = vld [vmem:[#allocation9 + $0x138] sm:$0xff]   ;;  %v3857_v7 = vld [vmem:[#allocation9 + $0x1b0] sm:$0xff]   ;;  %v3864_v12 = vld [vmem:[#allocation9 + $0x1e8] sm:$0xff]  }
  0x9a   : > { %1033 = vst [vmem:[#allocation3 + $0x4c] sm:$0xf] %v808_v61  ;;  %1047 = vst [vmem:[#allocation3 + $0x10] sm:$0xf] %v808_v61  ;;  %v433_v4 = vrot.slane %v429_v57, 4  ;;  %v440_v5 = vor.u32 %v438_v50, %v4530_v58  ;;  %3581 = vmatpush3.bf16.msra.mxu1 %v3847_v39  ;;  %v432_v8 = vor.u32 %v430_v48, %v429_v57  ;;  %v3853_v14 = vld [vmem:[#allocation9 + $0x170] sm:$0xff]  }
  0x9b   : > { %1034 = vst [vmem:[#allocation3 + $0x70] sm:$0xf] %v818_v3  ;;  %1048 = vst [vmem:[#allocation3 + $0x34] sm:$0xf] %v818_v3  ;;  %v1159_v9 = vsel %vm4495_vm13, %v3147_v59, %v1158_v62  ;;  %v822_v10 = vrot.slane %v820_v1, 4  ;;  %v825_v11 = vrot.slane %v823_v2, 5  ;;  %3582 = vmatprep.subr.bf16.mxu1 %v3854_v47 }
  0x9c   : > { %v3841_v13 = vld [vmem:[#allocation3] ss:$36 sps:$4 sm:$0xff]   ;;  %v441_v16 = vsel %vm4470_vm8, %v433_v4, %v440_v5  ;;  %1236 = vst [vmem:[#allocation3 + $0x98] sm:$0xf] %v1159_v9  ;;  %1250 = vst [vmem:[#allocation3 + $0x5c] sm:$0xf] %v1159_v9 }
  0x9d   : > { %1264 = vst [vmem:[#allocation3 + $0x20] sm:$0xf] %v1159_v9  ;;  %v829_v17 = vshll.u32 %v745_v55, 16  ;;  %v833_v18 = vshrl.u32 %v745_v55, 16  ;;  %v3843_v19 = vld [vmem:[#allocation3 + $0x4] ss:$36 sps:$4 sm:$0xff]   ;;  %v826_v21 = vor.u32 %v825_v11, %v822_v10 }
  0x9e   : > { %v3848_v20 = vld [vmem:[#allocation3 + $0x54] ss:$36 sps:$4 sm:$0xff]   ;;  %572 = vst [vmem:[#allocation2 + $0x28] sm:$0xf] %v441_v16  ;;  %v566_v25 = vld [vmem:[#allocation2 + $0x20] sm:$0x1]  ;;  %2347 = vmatprep.mubr.bf16.mxu0 %v3843_v19  ;;  %3583 = vmatpush3.bf16.msra.mxu1 %v3857_v7 }
  0x9f   : > { %v3850_v24 = vld [vmem:[#allocation3 + $0x50] ss:$36 sps:$4 sm:$0xff]   ;;  %v569_v26 = vld [vmem:[#allocation2 + $0x24] sm:$0xf]  ;;  %2452 = vmatprep.mubr.bf16.mxu1 %v3848_v20  ;;  %v567_v30 = vsel %vm4441_vm3, %v425_v40, %v566_v25  ;;  %v827_v32 = vrot.slane %v826_v21, 4  ;;  %v831_v33 = vrot.slane %v829_v17, 5  ;;  %2348 = vmatmul.mubr.bf16.vlgmr.msra.gmra.mxu0 %v3841_v13 }
  0xa0   : > { %v3867_v28 = vld [vmem:[#allocation9 + $0x1a8] sm:$0xff]   ;;  %v3856_v29 = vld [vmem:[#allocation9 + $0x130] sm:$0xff]   ;;  %v570_v31 = vsel %vm4464_vm7, %v432_v8, %v569_v26  ;;  %568 = vst [vmem:[#allocation2 + $0x20] sm:$0x1] %v567_v30  ;;  %v835_v34 = vrot.slane %v833_v18, 4  ;;  %v3874_v37 = vld [vmem:[#allocation9 + $0x1e0] sm:$0xff]   ;;  %3517 = vmatpush3.bf16.msra.mxu0 %v3846_v6  ;;  %3584 = vmatprep.subr.bf16.mxu1 %v3864_v12 }
  0xa1   : > { %571 = vst [vmem:[#allocation2 + $0x24] sm:$0xf] %v570_v31  ;;  %v3863_v35 = vld [vmem:[#allocation9 + $0x168] sm:$0xff]   ;;  %v4548_v38 = vrot.slane %v1158_v62, 4  ;;  %v832_v27 = vsel %vm4510_vm14, %v827_v32, %v831_v33  ;;  %v324_v40 = vld [vmem:[#allocation2 + $0x30] sm:$0x1]  ;;  %2453 = vmatmul.mubr.bf16.gmra.mxu1 %v3850_v24  ;;  %3518 = vmatprep.subr.bf16.mxu0 %v3853_v14 }
  0xa2   : > { %v353_v39 = vld [vmem:[#allocation2 + $0x2c] sm:$0x1]  ;;  %v3851_v41 = vld [vmem:[#allocation3 + $0x4c] ss:$36 sps:$4 sm:$0xff]   ;;  %v836_v43 = vor.u32 %v835_v34, %v831_v33  ;;  %1035 = vst [vmem:[#allocation3 + $0x94] sm:$0xf] %v832_v27  ;;  %3585 = vmatpush3.bf16.msra.mxu1 %v3867_v28 }
  0xa3   : > { %v3855_v42 = vld [vmem:[#allocation3 + $0x48] ss:$36 sps:$4 sm:$0xff]   ;;  %1049 = vst [vmem:[#allocation3 + $0x58] sm:$0xf] %v832_v27  ;;  %1063 = vst [vmem:[#allocation3 + $0x1c] sm:$0xf] %v832_v27  ;;  %2355 = vmatprep.mubr.bf16.mxu0 %v3851_v41  ;;  %3586 = vmatprep.subr.bf16.mxu1 %v3874_v37 }
  0xa4   : > { %v325_v44 = vsel %vm4441_vm3, 0, %v324_v40  ;;  %v442_v45 = vrot.slane %v4530_v58, 4  ;;  %v3866_v46 = vld [vmem:[#allocation9 + $0x128] sm:$0xff]   ;;  %v354_v47 = vsel %vm4446_vm4, 0, %v353_v39  ;;  %v380_v48 = vld [vmem:[%s4422_s30 + $0x18] sm:$0xf]  ;;  %3519 = vmatpush3.bf16.msra.mxu0 %v3856_v29 }
  0xa5   : > { %326 = vst [vmem:[#allocation2 + $0x30] sm:$0x1] %v325_v44  ;;  %v381_v49 = vld [vmem:[%s4422_s30 + $0x1c] sm:$0xf]  ;;  %v677_v50 = vld [vmem:[#allocation2 + $0x28] sm:$0xf]  ;;  %3520 = vmatprep.subr.bf16.mxu0 %v3863_v35 }
  0xa6   : > { %v837_v51 = vrot.slane %v836_v43, 4  ;;  %355 = vst [vmem:[#allocation2 + $0x2c] sm:$0x1] %v354_v47  ;;  %v444_v52 = vshrl.u32 %v380_v48, 16  ;;  %v447_v53 = vshll.u32 %v380_v48, 16  ;;  %v452_v54 = vshrl.u32 %v381_v49, 16 }
  0xa7   : > { %v3873_v55 = vld [vmem:[#allocation9 + $0x160] sm:$0xff]   ;;  %711 = vst [vmem:[#allocation3 + $0xc0] sm:$0xf] %v677_v50  ;;  %697 = vst [vmem:[#allocation3 + $0xfc] sm:$0xf] %v677_v50  ;;  %v455_v56 = vshll.u32 %v381_v49, 16  ;;  %2356 = vmatmul.mubr.bf16.gmra.mxu0 %v3855_v42 }
  0xa8   : > { %725 = vst [vmem:[#allocation3 + $0x84] sm:$0xf] %v677_v50  ;;  %v1089_v57 = vld [vmem:[#allocation2 + $0x28] sm:$0xf]  ;;  %v3877_v60 = vld [vmem:[#allocation9 + $0x1a0] sm:$0xff]   ;;  %v446_v61 = vrot.slane %v444_v52, 7  ;;  %3521 = vmatpush3.bf16.msra.mxu0 %v3866_v46 }
  0xa9   : > { %v4559_v59 = vld [vmem:[#allocation2 + $0x28] sm:$0xf]  ;;  %v4561_v62 = vrot.slane %v452_v54, 7  ;;  %v1165_v1 = vrot.slane %v1089_v57, 5  ;;  %v676_v3 = vld [vmem:[#allocation2 + $0x24] sm:$0xf]  ;;  %3587 = vmatpush3.bf16.msra.mxu1 %v3877_v60  ;;  %3522 = vmatprep.subr.bf16.mxu0 %v3873_v55 }
  0xaa   : > { %v853_v2 = vshll.u32 %v4559_v59, 16  ;;  %v1087_v4 = vld [vmem:[#allocation2 + $0x20] sm:$0x1]  ;;  %v3876_v6 = vld [vmem:[#allocation9 + $0x120] sm:$0xff]   ;;  %710 = vst [vmem:[#allocation3 + $0x9c] sm:$0xf] %v676_v3  ;;  %v449_v9 = vor.u32 %v447_v53, %v446_v61 }
  0xab   : > { %v746_v5 = vld [vmem:[#allocation2 + $0x20] sm:$0x1]  ;;  %v1161_v7 = vrot.slane %v1087_v4, 5  ;;  %696 = vst [vmem:[#allocation3 + $0xd8] sm:$0xf] %v676_v3  ;;  %v450_v10 = vrot.slane %v446_v61, 4  ;;  %v457_v13 = vor.u32 %v455_v56, %v4561_v62 }
  0xac   : > { %724 = vst [vmem:[#allocation3 + $0x60] sm:$0xf] %v676_v3  ;;  %v839_v8 = vshll.u32 %v746_v5, 16  ;;  %v1088_v11 = vld [vmem:[#allocation2 + $0x24] sm:$0xe]  ;;  %v3883_v12 = vld [vmem:[#allocation9 + $0x158] sm:$0xff]   ;;  %3523 = vmatpush3.bf16.msra.mxu0 %v3876_v6 }
  0xad   : > { %v459_v14 = vrot.slane %v4561_v62, 4  ;;  %v3148_v16 = vrot.slane %v1088_v11, 9  ;;  %v4566_v17 = vrot.slane %v1165_v1, 4  ;;  %v747_v18 = vld [vmem:[#allocation2 + $0x24] sm:$0xf]  ;;  %v1162_v19 = vsel %vm4495_vm13, %v4548_v38, %v1161_v7  ;;  %v3884_v26 = vld [vmem:[#allocation9 + $0x1d8] sm:$0xff]   ;;  %3524 = vmatprep.subr.bf16.mxu0 %v3883_v12 }
  0xae   : > { %v841_v20 = vrot.slane %v839_v8, 5  ;;  %v576_v21 = vld [vmem:[#allocation2 + $0x30] sm:$0xf]  ;;  %v844_v24 = vshrl.u32 %v747_v18, 16  ;;  %v847_v25 = vshll.u32 %v747_v18, 16  ;;  %v458_v28 = vsel %vm4470_vm8, %v450_v10, %v457_v13  ;;  %3588 = vmatprep.subr.bf16.mxu1 %v3884_v26  ;;  %v3893_v44 = vld [vmem:[#allocation9 + $0x150] sm:$0xff]  }
  0xaf   : > { %1237 = vst [vmem:[#allocation3 + $0xbc] sm:$0xf] %v1162_v19  ;;  %1251 = vst [vmem:[#allocation3 + $0x80] sm:$0xf] %v1162_v19  ;;  %v573_v29 = vld [vmem:[#allocation2 + $0x2c] sm:$0x1]  ;;  %v577_v30 = vsel %vm4464_vm7, %v449_v9, %v576_v21  ;;  %v1166_v31 = vsel %vm4495_vm13, %v3148_v16, %v1165_v1 }
  0xb0   : > { %1265 = vst [vmem:[#allocation3 + $0x44] sm:$0xf] %v1162_v19  ;;  %v855_v32 = vrot.slane %v853_v2, 5  ;;  %v3886_v33 = vld [vmem:[#allocation9 + $0x118] sm:$0xff]   ;;  %v842_v34 = vsel %vm4510_vm14, %v837_v51, %v841_v20  ;;  %v574_v35 = vsel %vm4441_vm3, %v442_v45, %v573_v29  ;;  %578 = vst [vmem:[#allocation2 + $0x30] sm:$0xf] %v577_v30 }
  0xb1   : > { %579 = vst [vmem:[#allocation2 + $0x34] sm:$0xf] %v458_v28  ;;  %1238 = vst [vmem:[#allocation3 + $0xe0] sm:$0xf] %v1166_v31  ;;  %v846_v37 = vrot.slane %v844_v24, 4  ;;  %v849_v38 = vrot.slane %v847_v25, 5  ;;  %3525 = vmatpush3.bf16.msra.mxu0 %v3886_v33 }
  0xb2   : > { %1266 = vst [vmem:[#allocation3 + $0x68] sm:$0xf] %v1166_v31  ;;  %1252 = vst [vmem:[#allocation3 + $0xa4] sm:$0xf] %v1166_v31  ;;  %v857_v27 = vshrl.u32 %v4559_v59, 16  ;;  %v3887_v58 = vld [vmem:[#allocation9 + $0x198] sm:$0xff]   ;;  %3526 = vmatprep.subr.bf16.mxu0 %v3893_v44 }
  0xb3   : > { %1036 = vst [vmem:[#allocation3 + $0xb8] sm:$0xf] %v842_v34  ;;  %1050 = vst [vmem:[#allocation3 + $0x7c] sm:$0xf] %v842_v34  ;;  %v850_v40 = vor.u32 %v849_v38, %v846_v37  ;;  %v327_v39 = vld [vmem:[#allocation2 + $0x3c] sm:$0x1]  ;;  %3589 = vmatpush3.bf16.msra.mxu1 %v3887_v58 }
  0xb4   : > { %1064 = vst [vmem:[#allocation3 + $0x40] sm:$0xf] %v842_v34  ;;  %575 = vst [vmem:[#allocation2 + $0x2c] sm:$0x1] %v574_v35  ;;  %v859_v41 = vrot.slane %v857_v27, 4  ;;  %v328_v42 = vsel %vm4441_vm3, 0, %v327_v39 }
  0xb5   : > { %v356_v43 = vld [vmem:[#allocation2 + $0x38] sm:$0x1]  ;;  %v851_v45 = vrot.slane %v850_v40, 4  ;;  %329 = vst [vmem:[#allocation2 + $0x3c] sm:$0x1] %v328_v42  ;;  %v3894_v53 = vld [vmem:[#allocation9 + $0x1d0] sm:$0xff]  }
  0xb6   : > { %v357_v46 = vsel %vm4446_vm4, 0, %v356_v43  ;;  %v382_v47 = vld [vmem:[%s4422_s30 + $0x20] sm:$0xf]  ;;  %v383_v48 = vld [vmem:[%s4422_s30 + $0x24] sm:$0xf]  ;;  %v860_v49 = vor.u32 %v859_v41, %v855_v32  ;;  %3590 = vmatprep.subr.bf16.mxu1 %v3894_v53  ;;  %v3896_v9 = vld [vmem:[#allocation9 + $0x110] sm:$0xff]  }
  0xb7   : > { %358 = vst [vmem:[#allocation2 + $0x38] sm:$0x1] %v357_v46  ;;  %v461_v50 = vshrl.u32 %v382_v47, 16  ;;  %v464_v51 = vshll.u32 %v382_v47, 16  ;;  %v469_v52 = vshrl.u32 %v383_v48, 16  ;;  %v856_v56 = vsel %vm4510_vm14, %v851_v45, %v855_v32  ;;  %v3897_v18 = vld [vmem:[#allocation9 + $0x190] sm:$0xff]   ;;  %3527 = vmatpush3.bf16.msra.mxu0 %v3896_v9 }
  0xb8   : > { %v3858_v54 = vld [vmem:[#allocation3 + $0x9c] ss:$36 sps:$4 sm:$0xff]   ;;  %v472_v57 = vshll.u32 %v383_v48, 16  ;;  %v678_v59 = vld [vmem:[#allocation2 + $0x30] sm:$0xf]  ;;  %v861_v61 = vrot.slane %v860_v49, 4  ;;  %3591 = vmatpush3.bf16.msra.mxu1 %v3897_v18 }
  0xb9   : > { %v3860_v55 = vld [vmem:[#allocation3 + $0x98] ss:$36 sps:$4 sm:$0xff]   ;;  %1037 = vst [vmem:[#allocation3 + $0xdc] sm:$0xf] %v856_v56  ;;  %1051 = vst [vmem:[#allocation3 + $0xa0] sm:$0xf] %v856_v56  ;;  %2460 = vmatprep.mubr.bf16.mxu1 %v3858_v54 }
  0xba   : > { %v679_v60 = vld [vmem:[#allocation2 + $0x34] sm:$0xf]  ;;  %1065 = vst [vmem:[#allocation3 + $0x64] sm:$0xf] %v856_v56  ;;  %v463_v1 = vrot.slane %v461_v50, 7  ;;  %v4592_v4 = vrot.slane %v469_v52, 7  ;;  %2461 = vmatmul.mubr.bf16.gmra.mxu1 %v3860_v55 }
  0xbb   : > { %v3861_v2 = vld [vmem:[#allocation3 + $0x94] ss:$36 sps:$4 sm:$0xff]   ;;  %712 = vst [vmem:[#allocation3 + $0xe4] sm:$0xf] %v678_v59  ;;  %713 = vst [vmem:[#allocation3 + $0x108] sm:$0xf] %v679_v60 }
  0xbc   : > { %v3865_v3 = vld [vmem:[#allocation3 + $0x90] ss:$36 sps:$4 sm:$0xff]   ;;  %698 = vst [vmem:[#allocation3 + $0x120] sm:$0xf] %v678_v59  ;;  %699 = vst [vmem:[#allocation3 + $0x144] sm:$0xf] %v679_v60  ;;  %v466_v7 = vor.u32 %v464_v51, %v463_v1  ;;  %2363 = vmatprep.mubr.bf16.mxu0 %v3861_v2  ;;  %v474_v12 = vor.u32 %v472_v57, %v4592_v4 }
  0xbd   : > { %726 = vst [vmem:[#allocation3 + $0xa8] sm:$0xf] %v678_v59  ;;  %727 = vst [vmem:[#allocation3 + $0xcc] sm:$0xf] %v679_v60  ;;  %v1090_v5 = vld [vmem:[#allocation2 + $0x2c] sm:$0x1]  ;;  %2364 = vmatmul.mubr.bf16.gmra.mxu0 %v3865_v3 }
  0xbe   : > { %v749_v6 = vld [vmem:[#allocation2 + $0x2c] sm:$0x1]  ;;  %v467_v8 = vrot.slane %v463_v1, 4  ;;  %v1168_v10 = vrot.slane %v1090_v5, 5  ;;  %v476_v13 = vrot.slane %v4592_v4, 4  ;;  %v3903_v24 = vld [vmem:[#allocation9 + $0x148] sm:$0xff]  }
  0xbf   : > { %v863_v11 = vshll.u32 %v749_v6, 16  ;;  %v1091_v16 = vld [vmem:[#allocation2 + $0x30] sm:$0xe]  ;;  %v583_v19 = vld [vmem:[#allocation2 + $0x3c] sm:$0xf]  ;;  %v3904_v32 = vld [vmem:[#allocation9 + $0x1c8] sm:$0xff]   ;;  %3528 = vmatprep.subr.bf16.mxu0 %v3903_v24 }
  0xc0   : > { %v1092_v20 = vld [vmem:[#allocation2 + $0x34] sm:$0xf]  ;;  %v3149_v21 = vrot.slane %v1091_v16, 9  ;;  %v1169_v25 = vsel %vm4495_vm13, %v4566_v17, %v1168_v10  ;;  %v475_v28 = vsel %vm4470_vm8, %v467_v8, %v474_v12  ;;  %v580_v29 = vld [vmem:[#allocation2 + $0x38] sm:$0x1]  ;;  %v584_v30 = vsel %vm4464_vm7, %v466_v7, %v583_v19  ;;  %v3906_v38 = vld [vmem:[#allocation9 + $0x108] sm:$0xff]   ;;  %3592 = vmatprep.subr.bf16.mxu1 %v3904_v32 }
  0xc1   : > { %v865_v26 = vrot.slane %v863_v11, 5  ;;  %v750_v31 = vld [vmem:[#allocation2 + $0x30] sm:$0xf]  ;;  %1239 = vst [vmem:[#allocation3 + $0x104] sm:$0xf] %v1169_v25  ;;  %v581_v17 = vsel %vm4441_vm3, %v459_v14, %v580_v29  ;;  %v1172_v33 = vrot.slane %v1092_v20, 5  ;;  %3529 = vmatpush3.bf16.msra.mxu0 %v3906_v38 }
  0xc2   : > { %1267 = vst [vmem:[#allocation3 + $0x8c] sm:$0xf] %v1169_v25  ;;  %1253 = vst [vmem:[#allocation3 + $0xc8] sm:$0xf] %v1169_v25  ;;  %v751_v34 = vld [vmem:[#allocation2 + $0x34] sm:$0xf] }
  0xc3   : > { %585 = vst [vmem:[#allocation2 + $0x3c] sm:$0xf] %v584_v30  ;;  %586 = vst [vmem:[#allocation2 + $0x40] sm:$0xf] %v475_v28  ;;  %v868_v35 = vshrl.u32 %v750_v31, 16  ;;  %v871_v37 = vshll.u32 %v750_v31, 16  ;;  %v866_v27 = vsel %vm4510_vm14, %v861_v61, %v865_v26  ;;  %v1173_v62 = vsel %vm4495_vm13, %v3149_v21, %v1172_v33 }
  0xc4   : > { %582 = vst [vmem:[#allocation2 + $0x38] sm:$0x1] %v581_v17  ;;  %v877_v58 = vshll.u32 %v751_v34, 16  ;;  %v881_v40 = vshrl.u32 %v751_v34, 16  ;;  %v3907_v39 = vld [vmem:[#allocation9 + $0x188] sm:$0xff]   ;;  %v1174_v14 = vrot.slane %v1172_v33, 4 }
  0xc5   : > { %1038 = vst [vmem:[#allocation3 + $0x100] sm:$0xf] %v866_v27  ;;  %1052 = vst [vmem:[#allocation3 + $0xc4] sm:$0xf] %v866_v27  ;;  %v870_v41 = vrot.slane %v868_v35, 4  ;;  %v873_v42 = vrot.slane %v871_v37, 5  ;;  %3593 = vmatpush3.bf16.msra.mxu1 %v3907_v39 }
  0xc6   : > { %1066 = vst [vmem:[#allocation3 + $0x88] sm:$0xf] %v866_v27  ;;  %1240 = vst [vmem:[#allocation3 + $0x128] sm:$0xf] %v1173_v62  ;;  %v879_v43 = vrot.slane %v877_v58, 5  ;;  %v883_v44 = vrot.slane %v881_v40, 4 }
  0xc7   : > { %1254 = vst [vmem:[#allocation3 + $0xec] sm:$0xf] %v1173_v62  ;;  %1268 = vst [vmem:[#allocation3 + $0xb0] sm:$0xf] %v1173_v62  ;;  %v874_v45 = vor.u32 %v873_v42, %v870_v41  ;;  %v330_v47 = vld [vmem:[#allocation2 + $0x48] sm:$0x1] }
  0xc8   : > { %v884_v46 = vor.u32 %v883_v44, %v879_v43  ;;  %v359_v48 = vld [vmem:[#allocation2 + $0x44] sm:$0x1]  ;;  %v384_v49 = vld [vmem:[%s4422_s30 + $0x28] sm:$0xf]  ;;  %v331_v51 = vsel %vm4441_vm3, 0, %v330_v47  ;;  %v3913_v19 = vld [vmem:[#allocation9 + $0x140] sm:$0xff]  }
  0xc9   : > { %v875_v50 = vrot.slane %v874_v45, 4  ;;  %v360_v52 = vsel %vm4446_vm4, 0, %v359_v48  ;;  %v385_v53 = vld [vmem:[%s4422_s30 + $0x2c] sm:$0xf]  ;;  %v478_v54 = vshrl.u32 %v384_v49, 16  ;;  %v481_v8 = vshll.u32 %v384_v49, 16  ;;  %3530 = vmatprep.subr.bf16.mxu0 %v3913_v19 }
  0xca   : > { %v3868_v55 = vld [vmem:[#allocation3 + $0xe4] ss:$36 sps:$4 sm:$0xff]   ;;  %v885_v57 = vrot.slane %v884_v46, 4  ;;  %332 = vst [vmem:[#allocation2 + $0x48] sm:$0x1] %v331_v51  ;;  %v486_v9 = vshrl.u32 %v385_v53, 16 }
  0xcb   : > { %v3870_v56 = vld [vmem:[#allocation3 + $0xe0] ss:$36 sps:$4 sm:$0xff]   ;;  %361 = vst [vmem:[#allocation2 + $0x44] sm:$0x1] %v360_v52  ;;  %v681_v60 = vld [vmem:[#allocation2 + $0x40] sm:$0xf]  ;;  %v880_v1 = vsel %vm4510_vm14, %v875_v50, %v879_v43  ;;  %2468 = vmatprep.mubr.bf16.mxu1 %v3868_v55 }
  0xcc   : > { %v680_v59 = vld [vmem:[#allocation2 + $0x3c] sm:$0xf]  ;;  %v1093_v61 = vld [vmem:[#allocation2 + $0x38] sm:$0x1]  ;;  %v3875_v3 = vld [vmem:[#allocation3 + $0xd8] ss:$36 sps:$4 sm:$0xff]   ;;  %2469 = vmatmul.mubr.bf16.gmra.mxu1 %v3870_v56 }
  0xcd   : > { %v3871_v2 = vld [vmem:[#allocation3 + $0xdc] ss:$36 sps:$4 sm:$0xff]   ;;  %714 = vst [vmem:[#allocation3 + $0x12c] sm:$0xf] %v680_v59  ;;  %715 = vst [vmem:[#allocation3 + $0x150] sm:$0xf] %v681_v60 }
  0xce   : > { %v1175_v5 = vrot.slane %v1093_v61, 5  ;;  %700 = vst [vmem:[#allocation3 + $0x168] sm:$0xf] %v680_v59  ;;  %701 = vst [vmem:[#allocation3 + $0x18c] sm:$0xf] %v681_v60  ;;  %v480_v7 = vrot.slane %v478_v54, 7  ;;  %2371 = vmatprep.mubr.bf16.mxu0 %v3871_v2 }
  0xcf   : > { %728 = vst [vmem:[#allocation3 + $0xf0] sm:$0xf] %v680_v59  ;;  %729 = vst [vmem:[#allocation3 + $0x114] sm:$0xf] %v681_v60  ;;  %v752_v6 = vld [vmem:[#allocation2 + $0x38] sm:$0x1]  ;;  %2372 = vmatmul.mubr.bf16.gmra.mxu0 %v3875_v3 }
  0xd0   : > { %1039 = vst [vmem:[#allocation3 + $0x124] sm:$0xf] %v880_v1  ;;  %1053 = vst [vmem:[#allocation3 + $0xe8] sm:$0xf] %v880_v1  ;;  %v489_v10 = vshll.u32 %v385_v53, 16  ;;  %v1176_v11 = vsel %vm4495_vm13, %v1174_v14, %v1175_v5  ;;  %v887_v12 = vshll.u32 %v752_v6, 16  ;;  %v483_v20 = vor.u32 %v481_v8, %v480_v7 }
  0xd1   : > { %1067 = vst [vmem:[#allocation3 + $0xac] sm:$0xf] %v880_v1  ;;  %v1094_v16 = vld [vmem:[#allocation2 + $0x3c] sm:$0xe]  ;;  %v1095_v18 = vld [vmem:[#allocation2 + $0x40] sm:$0xf] }
  0xd2   : > { %1241 = vst [vmem:[#allocation3 + $0x14c] sm:$0xf] %v1176_v11  ;;  %1255 = vst [vmem:[#allocation3 + $0x110] sm:$0xf] %v1176_v11  ;;  %v484_v21 = vrot.slane %v480_v7, 4  ;;  %v4621_v24 = vrot.slane %v486_v9, 7 }
  0xd3   : > { %1269 = vst [vmem:[#allocation3 + $0xd4] sm:$0xf] %v1176_v11  ;;  %v3150_v25 = vrot.slane %v1094_v16, 9  ;;  %v753_v26 = vld [vmem:[#allocation2 + $0x3c] sm:$0xf]  ;;  %v889_v29 = vrot.slane %v887_v12, 5 }
  0xd4   : > { %v3914_v28 = vld [vmem:[#allocation9 + $0x1c0] sm:$0xff]   ;;  %v1179_v30 = vrot.slane %v1095_v18, 5  ;;  %v754_v31 = vld [vmem:[#allocation2 + $0x40] sm:$0xf]  ;;  %v892_v32 = vshrl.u32 %v753_v26, 16  ;;  %v895_v17 = vshll.u32 %v753_v26, 16  ;;  %v491_v33 = vor.u32 %v489_v10, %v4621_v24 }
  0xd5   : > { %v493_v34 = vrot.slane %v4621_v24, 4  ;;  %v587_v35 = vld [vmem:[#allocation2 + $0x44] sm:$0x1]  ;;  %v590_v37 = vld [vmem:[#allocation2 + $0x48] sm:$0xf]  ;;  %v901_v38 = vshll.u32 %v754_v31, 16  ;;  %3594 = vmatprep.subr.bf16.mxu1 %v3914_v28  ;;  %v890_v27 = vsel %vm4510_vm14, %v885_v57, %v889_v29 }
  0xd6   : > { %v588_v58 = vsel %vm4441_vm3, %v476_v13, %v587_v35  ;;  %v591_v40 = vsel %vm4464_vm7, %v483_v20, %v590_v37  ;;  %v1180_v39 = vsel %vm4495_vm13, %v3150_v25, %v1179_v30  ;;  %1040 = vst [vmem:[#allocation3 + $0x148] sm:$0xf] %v890_v27  ;;  %1054 = vst [vmem:[#allocation3 + $0x10c] sm:$0xf] %v890_v27  ;;  %v1181_v14 = vrot.slane %v1179_v30, 4  ;;  %v3916_v41 = vld [vmem:[#allocation9 + $0x100] sm:$0xff]  }
  0xd7   : > { %1068 = vst [vmem:[#allocation3 + $0xd0] sm:$0xf] %v890_v27  ;;  %v492_v62 = vsel %vm4470_vm8, %v484_v21, %v491_v33  ;;  %589 = vst [vmem:[#allocation2 + $0x44] sm:$0x1] %v588_v58  ;;  %v894_v4 = vrot.slane %v892_v32, 4  ;;  %v897_v13 = vrot.slane %v895_v17, 5  ;;  %3531 = vmatpush3.bf16.msra.mxu0 %v3916_v41 }
  0xd8   : > { %592 = vst [vmem:[#allocation2 + $0x48] sm:$0xf] %v591_v40  ;;  %1242 = vst [vmem:[#allocation3 + $0x170] sm:$0xf] %v1180_v39  ;;  %v903_v42 = vrot.slane %v901_v38, 5  ;;  %v905_v43 = vshrl.u32 %v754_v31, 16 }
  0xd9   : > { %1256 = vst [vmem:[#allocation3 + $0x134] sm:$0xf] %v1180_v39  ;;  %1270 = vst [vmem:[#allocation3 + $0xf8] sm:$0xf] %v1180_v39  ;;  %v898_v44 = vor.u32 %v897_v13, %v894_v4  ;;  %v3878_v45 = vld [vmem:[#allocation3 + $0x12c] ss:$36 sps:$4 sm:$0xff]  }
  0xda   : > { %593 = vst [vmem:[#allocation2 + $0x4c] sm:$0xf] %v492_v62  ;;  %v3880_v46 = vld [vmem:[#allocation3 + $0x128] ss:$36 sps:$4 sm:$0xff]   ;;  %v907_v47 = vrot.slane %v905_v43, 4  ;;  %v3917_v51 = vld [vmem:[#allocation9 + $0x180] sm:$0xff]   ;;  %2476 = vmatprep.mubr.bf16.mxu1 %v3878_v45 }
  0xdb   : > { %v899_v48 = vrot.slane %v898_v44, 4  ;;  %v333_v49 = vld [vmem:[#allocation2 + $0x54] sm:$0x1]  ;;  %v362_v50 = vld [vmem:[#allocation2 + $0x50] sm:$0x1]  ;;  %2477 = vmatmul.mubr.bf16.gmra.mxu1 %v3880_v46 }
  0xdc   : > { %v908_v52 = vor.u32 %v907_v47, %v903_v42  ;;  %v334_v53 = vsel %vm4441_vm3, 0, %v333_v49  ;;  %v363_v54 = vsel %vm4446_vm4, 0, %v362_v50  ;;  %v386_v55 = vld [vmem:[%s4422_s30 + $0x30] sm:$0xf]  ;;  %v387_v56 = vld [vmem:[%s4422_s30 + $0x34] sm:$0xf]  ;;  %3595 = vmatpush3.bf16.msra.mxu1 %v3917_v51 }
  0xdd   : > { %v904_v57 = vsel %vm4510_vm14, %v899_v48, %v903_v42  ;;  %335 = vst [vmem:[#allocation2 + $0x54] sm:$0x1] %v334_v53  ;;  %364 = vst [vmem:[#allocation2 + $0x50] sm:$0x1] %v363_v54  ;;  %v495_v59 = vshrl.u32 %v386_v55, 16  ;;  %v498_v60 = vshll.u32 %v386_v55, 16 }
  0xde   : > { %v503_v61 = vshrl.u32 %v387_v56, 16  ;;  %v3881_v1 = vld [vmem:[#allocation3 + $0x124] ss:$36 sps:$4 sm:$0xff]   ;;  %v909_v3 = vrot.slane %v908_v52, 4  ;;  %1041 = vst [vmem:[#allocation3 + $0x16c] sm:$0xf] %v904_v57 }
  0xdf   : > { %v3885_v2 = vld [vmem:[#allocation3 + $0x120] ss:$36 sps:$4 sm:$0xff]   ;;  %1055 = vst [vmem:[#allocation3 + $0x130] sm:$0xf] %v904_v57  ;;  %1069 = vst [vmem:[#allocation3 + $0xf4] sm:$0xf] %v904_v57  ;;  %2379 = vmatprep.mubr.bf16.mxu0 %v3881_v1 }
  0xe0   : > { %v682_v5 = vld [vmem:[#allocation2 + $0x48] sm:$0xf]  ;;  %v1096_v7 = vld [vmem:[#allocation2 + $0x44] sm:$0x1]  ;;  %v497_v10 = vrot.slane %v495_v59, 7  ;;  %v4645_v11 = vrot.slane %v503_v61, 7  ;;  %2380 = vmatmul.mubr.bf16.gmra.mxu0 %v3885_v2 }
  0xe1   : > { %v683_v6 = vld [vmem:[#allocation2 + $0x4c] sm:$0xf]  ;;  %716 = vst [vmem:[#allocation3 + $0x174] sm:$0xf] %v682_v5  ;;  %v1182_v8 = vrot.slane %v1096_v7, 5  ;;  %v506_v12 = vshll.u32 %v387_v56, 16 }
  0xe2   : > { %717 = vst [vmem:[#allocation3 + $0x198] sm:$0xf] %v683_v6  ;;  %702 = vst [vmem:[#allocation3 + $0x1b0] sm:$0xf] %v682_v5  ;;  %v755_v9 = vld [vmem:[#allocation2 + $0x44] sm:$0x1]  ;;  %v500_v21 = vor.u32 %v498_v60, %v497_v10 }
  0xe3   : > { %703 = vst [vmem:[#allocation3 + $0x1d4] sm:$0xf] %v683_v6  ;;  %730 = vst [vmem:[#allocation3 + $0x138] sm:$0xf] %v682_v5  ;;  %v911_v16 = vshll.u32 %v755_v9, 16  ;;  %v1183_v20 = vsel %vm4495_vm13, %v1181_v14, %v1182_v8  ;;  %v501_v25 = vrot.slane %v497_v10, 4  ;;  %v508_v26 = vor.u32 %v506_v12, %v4645_v11 }
  0xe4   : > { %731 = vst [vmem:[#allocation3 + $0x15c] sm:$0xf] %v683_v6  ;;  %v1097_v18 = vld [vmem:[#allocation2 + $0x48] sm:$0xe]  ;;  %v1098_v19 = vld [vmem:[#allocation2 + $0x4c] sm:$0xf] }
  0xe5   : > { %v756_v28 = vld [vmem:[#allocation2 + $0x48] sm:$0xf]  ;;  %v757_v29 = vld [vmem:[#allocation2 + $0x4c] sm:$0xf]  ;;  %1243 = vst [vmem:[#allocation3 + $0x194] sm:$0xf] %v1183_v20  ;;  %v509_v33 = vsel %vm4470_vm8, %v501_v25, %v508_v26 }
  0xe6   : > { %1257 = vst [vmem:[#allocation3 + $0x158] sm:$0xf] %v1183_v20  ;;  %1271 = vst [vmem:[#allocation3 + $0x11c] sm:$0xf] %v1183_v20  ;;  %v913_v30 = vrot.slane %v911_v16, 5  ;;  %v510_v31 = vrot.slane %v4645_v11, 4 }
  0xe7   : > { %v3151_v32 = vrot.slane %v1097_v18, 9  ;;  %v1186_v17 = vrot.slane %v1098_v19, 5  ;;  %v594_v35 = vld [vmem:[#allocation2 + $0x50] sm:$0x1]  ;;  %v597_v37 = vld [vmem:[#allocation2 + $0x54] sm:$0xf] }
  0xe8   : > { %v916_v38 = vshrl.u32 %v756_v28, 16  ;;  %v919_v27 = vshll.u32 %v756_v28, 16  ;;  %v914_v58 = vsel %vm4510_vm14, %v909_v3, %v913_v30  ;;  %v595_v40 = vsel %vm4441_vm3, %v493_v34, %v594_v35  ;;  %600 = vst [vmem:[#allocation2 + $0x58] sm:$0xf] %v509_v33  ;;  %v336_v43 = vld [vmem:[#allocation2 + $0x60] sm:$0x1] }
  0xe9   : > { %v598_v39 = vsel %vm4464_vm7, %v500_v21, %v597_v37  ;;  %v1187_v62 = vsel %vm4495_vm13, %v3151_v32, %v1186_v17  ;;  %1042 = vst [vmem:[#allocation3 + $0x190] sm:$0xf] %v914_v58  ;;  %1056 = vst [vmem:[#allocation3 + $0x154] sm:$0xf] %v914_v58  ;;  %v1188_v14 = vrot.slane %v1186_v17, 4  ;;  %v925_v34 = vshll.u32 %v757_v29, 16 }
  0xea   : > { %1070 = vst [vmem:[#allocation3 + $0x118] sm:$0xf] %v914_v58  ;;  %596 = vst [vmem:[#allocation2 + $0x50] sm:$0x1] %v595_v40  ;;  %v918_v24 = vrot.slane %v916_v38, 4  ;;  %v921_v4 = vrot.slane %v919_v27, 5 }
  0xeb   : > { %599 = vst [vmem:[#allocation2 + $0x54] sm:$0xf] %v598_v39  ;;  %1244 = vst [vmem:[#allocation3 + $0x1b8] sm:$0xf] %v1187_v62  ;;  %v929_v13 = vshrl.u32 %v757_v29, 16  ;;  %v927_v42 = vrot.slane %v925_v34, 5 }
  0xec   : > { %1258 = vst [vmem:[#allocation3 + $0x17c] sm:$0xf] %v1187_v62  ;;  %1272 = vst [vmem:[#allocation3 + $0x140] sm:$0xf] %v1187_v62  ;;  %v922_v41 = vor.u32 %v921_v4, %v918_v24  ;;  %v337_v45 = vsel %vm4441_vm3, 0, %v336_v43  ;;  %v4669_v56 = vld [vmem:[#allocation9 + $0x238] sm:$0xff]  }
  0xed   : > { %v931_v44 = vrot.slane %v929_v13, 4  ;;  %v365_v46 = vld [vmem:[#allocation2 + $0x5c] sm:$0x1]  ;;  %v388_v47 = vld [vmem:[%s4422_s30 + $0x38] sm:$0xf]  ;;  %3660 = vmatprep.subr.bf16.mxu0 %v4669_v56  ;;  %3692 = vmatprep.subr.bf16.mxu1 %v4669_v56 }
  0xee   : > { %v3888_v48 = vld [vmem:[#allocation3 + $0x174] ss:$36 sps:$4 sm:$0xff]   ;;  %v923_v50 = vrot.slane %v922_v41, 4  ;;  %338 = vst [vmem:[#allocation2 + $0x60] sm:$0x1] %v337_v45  ;;  %v366_v52 = vsel %vm4446_vm4, 0, %v365_v46 }
  0xef   : > { %v3890_v49 = vld [vmem:[#allocation3 + $0x170] ss:$36 sps:$4 sm:$0xff]   ;;  %v932_v51 = vor.u32 %v931_v44, %v927_v42  ;;  %v389_v53 = vld [vmem:[%s4422_s30 + $0x3c] sm:$0xf]  ;;  %v512_v54 = vshrl.u32 %v388_v47, 16  ;;  %v515_v55 = vshll.u32 %v388_v47, 16  ;;  %2484 = vmatprep.mubr.bf16.mxu1 %v3888_v48 }
  0xf0   : > { %v685_v57 = vld [vmem:[#allocation2 + $0x58] sm:$0xf]  ;;  %v928_v59 = vsel %vm4510_vm14, %v923_v50, %v927_v42  ;;  %367 = vst [vmem:[#allocation2 + $0x5c] sm:$0x1] %v366_v52  ;;  %v520_v60 = vshrl.u32 %v389_v53, 16  ;;  %v523_v61 = vshll.u32 %v389_v53, 16  ;;  %2485 = vmatmul.mubr.bf16.gmra.mxu1 %v3890_v49 }
  0xf1   : > { %v4673_v1 = vld [vmem:[#allocation2 + $0x58] sm:$0xf]  ;;  %v3891_v2 = vld [vmem:[#allocation3 + $0x16c] ss:$36 sps:$4 sm:$0xff]   ;;  %719 = vst [vmem:[#allocation3 + $0x1e0] sm:$0xf] %v685_v57 }
  0xf2   : > { %v3895_v3 = vld [vmem:[#allocation3 + $0x168] ss:$36 sps:$4 sm:$0xff]   ;;  %705 = vst [vmem:[#allocation3 + $0x21c] sm:$0xf] %v685_v57  ;;  %733 = vst [vmem:[#allocation3 + $0x1a4] sm:$0xf] %v685_v57  ;;  %2387 = vmatprep.mubr.bf16.mxu0 %v3891_v2 }
  0xf3   : > { %v933_v5 = vrot.slane %v932_v51, 4  ;;  %1043 = vst [vmem:[#allocation3 + $0x1b4] sm:$0xf] %v928_v59  ;;  %1057 = vst [vmem:[#allocation3 + $0x178] sm:$0xf] %v928_v59  ;;  %v514_v12 = vrot.slane %v512_v54, 7  ;;  %2388 = vmatmul.mubr.bf16.gmra.mxu0 %v3895_v3 }
  0xf4   : > { %1071 = vst [vmem:[#allocation3 + $0x13c] sm:$0xf] %v928_v59  ;;  %v684_v6 = vld [vmem:[#allocation2 + $0x54] sm:$0xf]  ;;  %v1099_v7 = vld [vmem:[#allocation2 + $0x50] sm:$0x1] }
  0xf5   : > { %v758_v8 = vld [vmem:[#allocation2 + $0x50] sm:$0x1]  ;;  %718 = vst [vmem:[#allocation3 + $0x1bc] sm:$0xf] %v684_v6  ;;  %v1189_v9 = vrot.slane %v1099_v7, 5  ;;  %v4677_v16 = vrot.slane %v520_v60, 7  ;;  %v517_v29 = vor.u32 %v515_v55, %v514_v12 }
  0xf6   : > { %704 = vst [vmem:[#allocation3 + $0x1f8] sm:$0xf] %v684_v6  ;;  %732 = vst [vmem:[#allocation3 + $0x180] sm:$0xf] %v684_v6  ;;  %v935_v10 = vshll.u32 %v758_v8, 16  ;;  %v1193_v20 = vrot.slane %v4673_v1, 5 }
  0xf7   : > { %v1100_v18 = vld [vmem:[#allocation2 + $0x54] sm:$0xe]  ;;  %v760_v25 = vld [vmem:[#allocation2 + $0x58] sm:$0xf]  ;;  %v1190_v26 = vsel %vm4495_vm13, %v1188_v14, %v1189_v9  ;;  %v518_v30 = vrot.slane %v514_v12, 4  ;;  %v525_v17 = vor.u32 %v523_v61, %v4677_v16  ;;  %v3930_v9 = vld [vmem:[#allocation9 + $0x230] sm:$0xff]  }
  0xf8   : > { %v3152_v19 = vrot.slane %v1100_v18, 9  ;;  %v759_v21 = vld [vmem:[#allocation2 + $0x54] sm:$0xf]  ;;  %v937_v28 = vrot.slane %v935_v10, 5  ;;  %v604_v32 = vld [vmem:[#allocation2 + $0x60] sm:$0xf] }
  0xf9   : > { %1245 = vst [vmem:[#allocation3 + $0x1dc] sm:$0xf] %v1190_v26  ;;  %1259 = vst [vmem:[#allocation3 + $0x1a0] sm:$0xf] %v1190_v26  ;;  %v601_v37 = vld [vmem:[#allocation2 + $0x5c] sm:$0x1]  ;;  %v605_v38 = vsel %vm4464_vm7, %v517_v29, %v604_v32  ;;  %v526_v40 = vsel %vm4470_vm8, %v518_v30, %v525_v17 }
  0xfa   : > { %1273 = vst [vmem:[#allocation3 + $0x164] sm:$0xf] %v1190_v26  ;;  %v1194_v33 = vsel %vm4495_vm13, %v3152_v19, %v1193_v20  ;;  %v938_v35 = vsel %vm4510_vm14, %v933_v5, %v937_v28  ;;  %v940_v27 = vshrl.u32 %v759_v21, 16  ;;  %v943_v58 = vshll.u32 %v759_v21, 16  ;;  %606 = vst [vmem:[#allocation2 + $0x60] sm:$0xf] %v605_v38 }
  0xfb   : > { %1246 = vst [vmem:[#allocation3 + $0x200] sm:$0xf] %v1194_v33  ;;  %1274 = vst [vmem:[#allocation3 + $0x188] sm:$0xf] %v1194_v33  ;;  %v602_v39 = vsel %vm4441_vm3, %v510_v31, %v601_v37  ;;  %v949_v62 = vshll.u32 %v760_v25, 16  ;;  %v953_v14 = vshrl.u32 %v760_v25, 16 }
  0xfc   : > { %1260 = vst [vmem:[#allocation3 + $0x1c4] sm:$0xf] %v1194_v33  ;;  %1044 = vst [vmem:[#allocation3 + $0x1d8] sm:$0xf] %v938_v35  ;;  %v942_v24 = vrot.slane %v940_v27, 4  ;;  %v945_v4 = vrot.slane %v943_v58, 5 }
  0xfd   : > { %1058 = vst [vmem:[#allocation3 + $0x19c] sm:$0xf] %v938_v35  ;;  %1072 = vst [vmem:[#allocation3 + $0x160] sm:$0xf] %v938_v35  ;;  %v951_v34 = vrot.slane %v949_v62, 5  ;;  %v955_v13 = vrot.slane %v953_v14, 4 }
  0xfe   : > { %603 = vst [vmem:[#allocation2 + $0x5c] sm:$0x1] %v602_v39  ;;  %607 = vst [vmem:[#allocation2 + $0x64] sm:$0xf] %v526_v40  ;;  %v946_v41 = vor.u32 %v945_v4, %v942_v24  ;;  %v3898_v42 = vld [vmem:[#allocation3 + $0x1bc] ss:$36 sps:$4 sm:$0xff]  }
  0xff   : > { %v956_v45 = vor.u32 %v955_v13, %v951_v34  ;;  %2492 = vmatprep.mubr.bf16.mxu1 %v3898_v42  ;;  %v3905_v11 = vld [vmem:[#allocation3 + $0x1b0] ss:$36 sps:$4 sm:$0xff]   ;;  %v1195_v47 = vrot.slane %v1193_v20, 4  ;;  %v3920_v60 = vld [vmem:[#allocation3 + $0x1c] ss:$36 sps:$4 sm:$0xff]   ;;  %v527_v26 = vrot.slane %v4677_v16, 4 }
 0x100   : > { %v3900_v43 = vld [vmem:[#allocation3 + $0x1b8] ss:$36 sps:$4 sm:$0xff]   ;;  %v947_v44 = vrot.slane %v946_v41, 4  ;;  %v3925_v7 = vld [vmem:[#allocation3 + $0x64] ss:$36 sps:$4 sm:$0xff]  }
 0x101   : > { %2493 = vmatmul.mubr.bf16.gmra.mxu1 %v3900_v43  ;;  %v686_v48 = vld [vmem:[#allocation2 + $0x60] sm:$0xf]  ;;  %v957_v53 = vrot.slane %v956_v45, 4  ;;  %v3923_v2 = vld [vmem:[#allocation3 + $0x14] ss:$36 sps:$4 sm:$0xff]   ;;  %v3944_v24 = vld [vmem:[#allocation9 + $0x220] sm:$0xff]  }
 0x102   : > { %v952_v31 = vsel %vm4510_vm14, %v947_v44, %v951_v34  ;;  %720 = vst [vmem:[#allocation3 + $0x204] sm:$0xf] %v686_v48  ;;  %734 = vst [vmem:[#allocation3 + $0x1c8] sm:$0xf] %v686_v48  ;;  %v3915_v5 = vld [vmem:[#allocation3 + $0x1f8] ss:$36 sps:$4 sm:$0xff]  }
 0x103   : > { %v3901_v46 = vld [vmem:[#allocation3 + $0x1b4] ss:$36 sps:$4 sm:$0xff]   ;;  %1045 = vst [vmem:[#allocation3 + $0x1fc] sm:$0xf] %v952_v31  ;;  %1059 = vst [vmem:[#allocation3 + $0x1c0] sm:$0xf] %v952_v31 }
 0x104   : > { %1073 = vst [vmem:[#allocation3 + $0x184] sm:$0xf] %v952_v31  ;;  %2395 = vmatprep.mubr.bf16.mxu0 %v3901_v46  ;;  %v3918_v6 = vld [vmem:[#allocation3 + $0x18] ss:$36 sps:$4 sm:$0xff]   ;;  %v3921_v8 = vld [vmem:[#allocation3 + $0x10] ss:$36 sps:$4 sm:$0xff]  }
 0x105   : > { %v687_v49 = vld [vmem:[#allocation2 + $0x64] sm:$0xf]  ;;  %v1102_v50 = vld [vmem:[#allocation2 + $0x5c] sm:$0x1]  ;;  %2396 = vmatmul.mubr.bf16.gmra.mxu0 %v3905_v11  ;;  %v368_v10 = vld [vmem:[#allocation2 + $0x68] sm:$0x1] }
 0x106   : > { %721 = vst [vmem:[#allocation3 + $0x228] sm:$0xf] %v687_v49  ;;  %v1196_v51 = vrot.slane %v1102_v50, 5  ;;  %735 = vst [vmem:[#allocation3 + $0x1ec] sm:$0xf] %v687_v49  ;;  %v369_v12 = vsel %vm4446_vm4, 0, %v368_v10 }
 0x107   : > { %v761_v52 = vld [vmem:[#allocation2 + $0x5c] sm:$0x1]  ;;  %v762_v18 = vld [vmem:[#allocation2 + $0x60] sm:$0xf]  ;;  %v763_v19 = vld [vmem:[#allocation2 + $0x64] sm:$0xf] }
 0x108   : > { %v959_v54 = vshll.u32 %v761_v52, 16  ;;  %v1197_v55 = vsel %vm4495_vm13, %v1195_v47, %v1196_v51  ;;  %v3928_v20 = vld [vmem:[#allocation3 + $0x5c] ss:$36 sps:$4 sm:$0xff]   ;;  %370 = vst [vmem:[#allocation2 + $0x68] sm:$0x1] %v369_v12  ;;  %v964_v21 = vshrl.u32 %v762_v18, 16 }
 0x109   : > { %1247 = vst [vmem:[#allocation3 + $0x224] sm:$0xf] %v1197_v55  ;;  %1275 = vst [vmem:[#allocation3 + $0x1ac] sm:$0xf] %v1197_v55  ;;  %v967_v25 = vshll.u32 %v762_v18, 16  ;;  %v3937_v29 = vld [vmem:[#allocation9 + $0x228] sm:$0xff]  }
 0x10a   : > { %1261 = vst [vmem:[#allocation3 + $0x1e8] sm:$0xf] %v1197_v55  ;;  %v961_v57 = vrot.slane %v959_v54, 5  ;;  %v3927_v28 = vld [vmem:[#allocation3 + $0x60] ss:$36 sps:$4 sm:$0xff]   ;;  %v966_v30 = vrot.slane %v964_v21, 4 }
 0x10b   : > { %v969_v32 = vrot.slane %v967_v25, 5  ;;  %v973_v17 = vshll.u32 %v763_v19, 16  ;;  %v977_v33 = vshrl.u32 %v763_v19, 16  ;;  %v3932_v35 = vld [vmem:[#allocation3 + $0xac] ss:$36 sps:$4 sm:$0xff]  }
 0x10c   : > { %v962_v59 = vsel %vm4510_vm14, %v957_v53, %v961_v57  ;;  %v339_v37 = vld [vmem:[#allocation2 + $0x6c] sm:$0x1]  ;;  %v371_v38 = vld [vmem:[#allocation2 + $0x74] sm:$0x1]  ;;  %v613_v27 = vld [vmem:[%s4430_s10 + $0x8] sm:$0xf] }
 0x10d   : > { %1046 = vst [vmem:[#allocation3 + $0x220] sm:$0xf] %v962_v59  ;;  %1060 = vst [vmem:[#allocation3 + $0x1e4] sm:$0xf] %v962_v59  ;;  %v3908_v61 = vld [vmem:[#allocation3 + $0x204] ss:$36 sps:$4 sm:$0xff]   ;;  %v970_v16 = vor.u32 %v969_v32, %v966_v30 }
 0x10e   : > { %1074 = vst [vmem:[#allocation3 + $0x1a8] sm:$0xf] %v962_v59  ;;  %2500 = vmatprep.mubr.bf16.mxu1 %v3908_v61  ;;  %v340_v58 = vsel %vm4441_vm3, 0, %v339_v37  ;;  %v372_v40 = vsel %vm4446_vm4, 0, %v371_v38  ;;  %v614_v39 = vld [vmem:[%s4430_s10 + $0xc] sm:$0xf] }
 0x10f   : > { %v1103_v62 = vld [vmem:[#allocation2 + $0x60] sm:$0xe]  ;;  %v3931_v14 = vld [vmem:[#allocation3 + $0x58] ss:$36 sps:$4 sm:$0xff]   ;;  %341 = vst [vmem:[#allocation2 + $0x6c] sm:$0x1] %v340_v58 }
 0x110   : > { %v3910_v1 = vld [vmem:[#allocation3 + $0x200] ss:$36 sps:$4 sm:$0xff]   ;;  %373 = vst [vmem:[#allocation2 + $0x74] sm:$0x1] %v372_v40  ;;  %v643_v4 = vshrl.u32 %v613_v27, 16  ;;  %v646_v34 = vshll.u32 %v613_v27, 16 }
 0x111   : > { %2501 = vmatmul.mubr.bf16.gmra.mxu1 %v3910_v1  ;;  %v651_v13 = vshrl.u32 %v614_v39, 16  ;;  %v1104_v41 = vld [vmem:[#allocation2 + $0x64] sm:$0xf]  ;;  %v3935_v42 = vld [vmem:[#allocation3 + $0xa4] ss:$36 sps:$4 sm:$0xff]   ;;  %v971_v43 = vrot.slane %v970_v16, 4 }
 0x112   : > { %2638 = vmatprep.mubr.bf16.mxu1 %v3920_v60  ;;  %v975_v44 = vrot.slane %v973_v17, 5  ;;  %v3153_v45 = vrot.slane %v1103_v62, 9  ;;  %v1200_v23 = vrot.slane %v1104_v41, 5  ;;  %v608_v46 = vld [vmem:[#allocation2 + $0x68] sm:$0x1]  ;;  %v645_v11 = vrot.slane %v643_v4, 7 }
 0x113   : > { %v653_v47 = vrot.slane %v651_v13, 7  ;;  %v609_v31 = vsel %vm4441_vm3, %v527_v26, %v608_v46  ;;  %v979_v49 = vrot.slane %v977_v33, 4  ;;  %v3934_v55 = vld [vmem:[#allocation3 + $0xa8] ss:$36 sps:$4 sm:$0xff]   ;;  %v3951_v57 = vld [vmem:[#allocation9 + $0x218] sm:$0xff]  }
 0x114   : > { %v3911_v3 = vld [vmem:[#allocation3 + $0x1fc] ss:$36 sps:$4 sm:$0xff]   ;;  %v976_v48 = vsel %vm4510_vm14, %v971_v43, %v975_v44  ;;  %v1201_v50 = vsel %vm4495_vm13, %v3153_v45, %v1200_v23  ;;  %610 = vst [vmem:[#allocation2 + $0x68] sm:$0x1] %v609_v31  ;;  %v648_v51 = vor.u32 %v646_v34, %v645_v11  ;;  %v649_v52 = vrot.slane %v645_v11, 4 }
 0x115   : > { %2403 = vmatprep.mubr.bf16.mxu0 %v3911_v3  ;;  %1075 = vst [vmem:[#allocation3 + $0x1cc] sm:$0xf] %v976_v48  ;;  %1061 = vst [vmem:[#allocation3 + $0x208] sm:$0xf] %v976_v48  ;;  %v658_v54 = vrot.slane %v653_v47, 4 }
 0x116   : > { %2404 = vmatmul.mubr.bf16.gmra.mxu0 %v3915_v5  ;;  %1262 = vst [vmem:[#allocation3 + $0x20c] sm:$0xf] %v1201_v50  ;;  %1276 = vst [vmem:[#allocation3 + $0x1d0] sm:$0xf] %v1201_v50  ;;  %v663_v60 = vld [vmem:[#allocation2 + $0x6c] sm:$0xf] }
 0x117   : > { %2541 = vmatprep.mubr.bf16.mxu0 %v3923_v2  ;;  %v667_v61 = vld [vmem:[#allocation2 + $0x74] sm:$0x1]  ;;  %v3939_v1 = vld [vmem:[#allocation3 + $0xf4] ss:$36 sps:$4 sm:$0xff]   ;;  %v980_v2 = vor.u32 %v979_v49, %v975_v44  ;;  %v664_v3 = vsel %vm4464_vm7, %v648_v51, %v663_v60  ;;  %v3942_v0 = vld [vmem:[#allocation3 + $0xec] ss:$36 sps:$4 sm:$0xff]  }
 0x118   : > { %v668_v5 = vsel %vm4441_vm3, %v658_v54, %v667_v61  ;;  %665 = vst [vmem:[#allocation2 + $0x6c] sm:$0xf] %v664_v3  ;;  %v3941_v19 = vld [vmem:[#allocation3 + $0xf0] ss:$36 sps:$4 sm:$0xff]   ;;  %v3945_v17 = vld [vmem:[#allocation3 + $0xe8] ss:$36 sps:$4 sm:$0xff]  }
 0x119   : > { %2639 = vmatmul.mubr.bf16.vlgmr.msra.gmra.mxu1 %v3918_v6  ;;  %669 = vst [vmem:[#allocation2 + $0x74] sm:$0x1] %v668_v5  ;;  %v3938_v6 = vld [vmem:[#allocation3 + $0xa0] ss:$36 sps:$4 sm:$0xff]   ;;  %v981_v12 = vrot.slane %v980_v2, 4 }
 0x11a   : > { %3700 = vmatpush3.bf16.msra.mxu1 %v4669_v56  ;;  %2646 = vmatprep.mubr.bf16.mxu1 %v3925_v7  ;;  %v3958_v7 = vld [vmem:[#allocation9 + $0x210] sm:$0xff]   ;;  %v3948_v31 = vld [vmem:[#allocation3 + $0x138] ss:$36 sps:$4 sm:$0xff]   ;;  %v3953_v50 = vld [vmem:[#allocation3 + $0x184] ss:$36 sps:$4 sm:$0xff]  }
 0x11b   : > { %3693 = vmatprep.subr.bf16.mxu1 %v3930_v9  ;;  %v1105_v10 = vld [vmem:[#allocation2 + $0x68] sm:$0x1]  ;;  %v3949_v13 = vld [vmem:[#allocation3 + $0x134] ss:$36 sps:$4 sm:$0xff]   ;;  %v3956_v36 = vld [vmem:[#allocation3 + $0x17c] ss:$36 sps:$4 sm:$0xff]  }
 0x11c   : > { %v1203_v18 = vrot.slane %v1105_v10, 5  ;;  %v3966_v60 = vld [vmem:[#allocation3 + $0x1c0] ss:$36 sps:$4 sm:$0xff]   ;;  %v3981_v10 = vld [vmem:[#allocation3 + $0xf8] ss:$36 sps:$4 sm:$0xff]  }
 0x11d   : > { %v3974_v2 = vld [vmem:[#allocation3 + $0x140] ss:$36 sps:$4 sm:$0xff]  }
 0x11e   : > { %2542 = vmatmul.mubr.bf16.vlgmr.msra.gmra.mxu0 %v3921_v8  ;;  %3701 = vmatpush3.bf16.msra.mxu1 %v3930_v9  ;;  %v1202_v8 = vrot.slane %v1200_v23, 4  ;;  %v3976_v5 = vld [vmem:[#allocation3 + $0x20] ss:$36 sps:$4 sm:$0xff]  }
 0x11f   : > { %3661 = vmatpush3.bf16.msra.mxu0 %v4669_v56  ;;  %2549 = vmatprep.mubr.bf16.mxu0 %v3928_v20  ;;  %v654_v56 = vshll.u32 %v614_v39, 16  ;;  %v3965_v20 = vld [vmem:[#allocation9 + $0x208] sm:$0xff]   ;;  %v765_v37 = vld [vmem:[#allocation2 + $0x6c] sm:$0xf] }
 0x120   : > { %3662 = vmatprep.subr.bf16.mxu0 %v3930_v9  ;;  %3694 = vmatprep.subr.bf16.mxu1 %v3937_v29  ;;  %v1204_v26 = vsel %vm4495_vm13, %v1202_v8, %v1203_v18  ;;  %v767_v38 = vld [vmem:[#allocation2 + $0x74] sm:$0x1]  ;;  %v988_v27 = vshrl.u32 %v765_v37, 16  ;;  %v991_v16 = vshll.u32 %v765_v37, 16  ;;  %v1106_v39 = vld [vmem:[#allocation2 + $0x6c] sm:$0xe] }
 0x121   : > { %2647 = vmatmul.mubr.bf16.gmra.mxu1 %v3927_v28  ;;  %v656_v53 = vor.u32 %v654_v56, %v653_v47  ;;  %v3946_v28 = vld [vmem:[#allocation3 + $0x13c] ss:$36 sps:$4 sm:$0xff]   ;;  %1263 = vst [vmem:[#allocation3 + $0x230] sm:$0xf] %v1204_v26  ;;  %1277 = vst [vmem:[#allocation3 + $0x1f4] sm:$0xf] %v1204_v26 }
 0x122   : > { %2654 = vmatprep.mubr.bf16.mxu1 %v3932_v35  ;;  %3702 = vmatpush3.bf16.msra.mxu1 %v3937_v29  ;;  %v688_v35 = vld [vmem:[#allocation2 + $0x6c] sm:$0xf]  ;;  %v1007_v62 = vshll.u32 %v767_v38, 16  ;;  %v3154_v4 = vrot.slane %v1106_v39, 9  ;;  %v990_v56 = vrot.slane %v988_v27, 4  ;;  %v993_v41 = vrot.slane %v991_v16, 5 }
 0x123   : > { %3663 = vmatpush3.bf16.msra.mxu0 %v3930_v9  ;;  %3695 = vmatprep.subr.bf16.mxu1 %v3944_v24  ;;  %v657_v59 = vsel %vm4470_vm8, %v649_v52, %v656_v53  ;;  %v764_v9 = vld [vmem:[#allocation2 + $0x68] sm:$0x1]  ;;  %736 = vst [vmem:[#allocation3 + $0x210] sm:$0xf] %v688_v35  ;;  %v3955_v53 = vld [vmem:[#allocation3 + $0x180] ss:$36 sps:$4 sm:$0xff]  }
 0x124   : > { %3664 = vmatprep.subr.bf16.mxu0 %v3937_v29  ;;  %666 = vst [vmem:[#allocation2 + $0x70] sm:$0xf] %v657_v59  ;;  %v983_v63 = vshll.u32 %v764_v9, 16  ;;  %v1009_v44 = vrot.slane %v1007_v62, 5  ;;  %v994_v46 = vor.u32 %v993_v41, %v990_v56  ;;  %v3952_v52 = vld [vmem:[#allocation3 + $0x130] ss:$36 sps:$4 sm:$0xff]  }
 0x125   : > { %v3962_v59 = vld [vmem:[#allocation3 + $0x1c8] ss:$36 sps:$4 sm:$0xff]   ;;  %v3980_v8 = vld [vmem:[#allocation3 + $0xb0] ss:$36 sps:$4 sm:$0xff]  }
 0x126   : > { %2550 = vmatmul.mubr.bf16.gmra.mxu0 %v3931_v14  ;;  %3703 = vmatpush3.bf16.msra.mxu1 %v3944_v24  ;;  %v985_v22 = vrot.slane %v983_v63, 5  ;;  %v3972_v14 = vld [vmem:[#allocation9 + $0x200] sm:$0xff]   ;;  %v995_v48 = vrot.slane %v994_v46, 4 }
 0x127   : > { %2557 = vmatprep.mubr.bf16.mxu0 %v3935_v42  ;;  %3665 = vmatpush3.bf16.msra.mxu0 %v3937_v29 }
 0x128   : > { %3666 = vmatprep.subr.bf16.mxu0 %v3944_v24  ;;  %3696 = vmatprep.subr.bf16.mxu1 %v3951_v57  ;;  %v986_v33 = vsel %vm4510_vm14, %v981_v12, %v985_v22  ;;  %v3970_v61 = vld [vmem:[#allocation3 + $0x20c] ss:$36 sps:$4 sm:$0xff]  }
 0x129   : > { %2655 = vmatmul.mubr.bf16.gmra.mxu1 %v3934_v55  ;;  %1076 = vst [vmem:[#allocation3 + $0x1f0] sm:$0xf] %v986_v33  ;;  %1062 = vst [vmem:[#allocation3 + $0x22c] sm:$0xf] %v986_v33  ;;  %v3959_v55 = vld [vmem:[#allocation3 + $0x178] ss:$36 sps:$4 sm:$0xff]  }
 0x12a   : > { %2662 = vmatprep.mubr.bf16.mxu1 %v3939_v1  ;;  %3704 = vmatpush3.bf16.msra.mxu1 %v3951_v57 }
 0x12b   : > { %3667 = vmatpush3.bf16.msra.mxu0 %v3944_v24  ;;  %3697 = vmatprep.subr.bf16.mxu1 %v3958_v7  ;;  %v689_v21 = vld [vmem:[#allocation2 + $0x70] sm:$0xf]  ;;  %v1108_v24 = vld [vmem:[#allocation2 + $0x74] sm:$0x1] }
 0x12c   : > { %3668 = vmatprep.subr.bf16.mxu0 %v3951_v57  ;;  %v766_v25 = vld [vmem:[#allocation2 + $0x70] sm:$0xf]  ;;  %737 = vst [vmem:[#allocation3 + $0x234] sm:$0xf] %v689_v21  ;;  %v1210_v43 = vrot.slane %v1108_v24, 5 }
 0x12d   : > { %v997_v29 = vshll.u32 %v766_v25, 16  ;;  %v1001_v30 = vshrl.u32 %v766_v25, 16  ;;  %v1107_v32 = vld [vmem:[#allocation2 + $0x70] sm:$0xf]  ;;  %v4739_v25 = vld [vmem:[%s4978_s3] ss:$0 sm:$0xff] }
 0x12e   : > { %2558 = vmatmul.mubr.bf16.gmra.mxu0 %v3938_v6  ;;  %3705 = vmatpush3.bf16.msra.mxu1 %v3958_v7  ;;  %v1207_v34 = vrot.slane %v1107_v32, 5  ;;  %v3975_v6 = vld [vmem:[#allocation3 + $0x188] ss:$36 sps:$4 sm:$0xff]  }
 0x12f   : > { %2565 = vmatprep.mubr.bf16.mxu0 %v3942_v0  ;;  %3669 = vmatpush3.bf16.msra.mxu0 %v3951_v57  ;;  %v999_v58 = vrot.slane %v997_v29, 5  ;;  %v1003_v40 = vrot.slane %v1001_v30, 4  ;;  %v3963_v57 = vld [vmem:[#allocation3 + $0x1c4] ss:$36 sps:$4 sm:$0xff]   ;;  %v3978_v0 = vld [vmem:[#allocation3 + $0x1d0] ss:$36 sps:$4 sm:$0xff]  }
 0x130   : > { %3670 = vmatprep.subr.bf16.mxu0 %v3958_v7  ;;  %3698 = vmatprep.subr.bf16.mxu1 %v3965_v20  ;;  %v1208_v45 = vsel %vm4495_vm13, %v3154_v4, %v1207_v34  ;;  %v1209_v23 = vrot.slane %v1207_v34, 4  ;;  %v3960_v54 = vld [vmem:[#allocation3 + $0x1cc] ss:$36 sps:$4 sm:$0xff]  }
 0x131   : > { %2663 = vmatmul.mubr.bf16.gmra.mxu1 %v3941_v19  ;;  %v1004_v42 = vor.u32 %v1003_v40, %v999_v58  ;;  %1278 = vst [vmem:[#allocation3 + $0x218] sm:$0xf] %v1208_v45  ;;  %v1000_v51 = vsel %vm4510_vm14, %v995_v48, %v999_v58  ;;  %v3973_v3 = vld [vmem:[#allocation3 + $0x208] ss:$36 sps:$4 sm:$0xff]  }
 0x132   : > { %2670 = vmatprep.mubr.bf16.mxu1 %v3946_v28  ;;  %3706 = vmatpush3.bf16.msra.mxu1 %v3965_v20  ;;  %v1211_v47 = vsel %vm4495_vm13, %v1209_v23, %v1210_v43  ;;  %1077 = vst [vmem:[#allocation3 + $0x214] sm:$0xf] %v1000_v51 }
 0x133   : > { %3671 = vmatpush3.bf16.msra.mxu0 %v3958_v7  ;;  %v1005_v11 = vrot.slane %v1004_v42, 4  ;;  %3699 = vmatprep.subr.bf16.mxu1 %v3972_v14  ;;  %1279 = vst [vmem:[#allocation3 + $0x23c] sm:$0xf] %v1211_v47  ;;  %v3969_v1 = vld [vmem:[#allocation3 + $0x210] ss:$36 sps:$4 sm:$0xff]  }
 0x134   : > { %3672 = vmatprep.subr.bf16.mxu0 %v3965_v20  ;;  %v3977_v7 = vld [vmem:[#allocation3 + $0x68] ss:$36 sps:$4 sm:$0xff]  }
 0x135   : > { %v1010_v49 = vsel %vm4510_vm14, %v1005_v11, %v1009_v44 }
 0x136   : > { %2566 = vmatmul.mubr.bf16.gmra.mxu0 %v3945_v17  ;;  %1078 = vst [vmem:[#allocation3 + $0x238] sm:$0xf] %v1010_v49  ;;  %3707 = vmatpush3.bf16.msra.mxu1 %v3972_v14 }
 0x137   : > { %2573 = vmatprep.mubr.bf16.mxu0 %v3949_v13  ;;  %3673 = vmatpush3.bf16.msra.mxu0 %v3965_v20 }
 0x138   : > { %3674 = vmatprep.subr.bf16.mxu0 %v3972_v14 }
 0x139   : > { %2671 = vmatmul.mubr.bf16.gmra.mxu1 %v3948_v31 }
 0x13a   : > { %2678 = vmatprep.mubr.bf16.mxu1 %v3953_v50  ;;  %v3979_v9 = vld [vmem:[#allocation3 + $0x218] ss:$36 sps:$4 sm:$0xff]  }
 0x13b   : > { %3675 = vmatpush3.bf16.msra.mxu0 %v3972_v14 }
 0x13d   : > { %v3967_v15 = vld [vmem:[#allocation3 + $0x214] ss:$36 sps:$4 sm:$0xff]  }
 0x13e   : > { %2574 = vmatmul.mubr.bf16.gmra.mxu0 %v3952_v52 }
 0x13f   : > { %2581 = vmatprep.mubr.bf16.mxu0 %v3956_v36 }
 0x141   : > { %2679 = vmatmul.mubr.bf16.gmra.mxu1 %v3955_v53 }
 0x142   : > { %2686 = vmatprep.mubr.bf16.mxu1 %v3960_v54 }
 0x146   : > { %2582 = vmatmul.mubr.bf16.gmra.mxu0 %v3959_v55 }
 0x147   : > { %2589 = vmatprep.mubr.bf16.mxu0 %v3963_v57 }
 0x149   : > { %2687 = vmatmul.mubr.bf16.gmra.mxu1 %v3962_v59 }
 0x14a   : > { %2694 = vmatprep.mubr.bf16.mxu1 %v3967_v15 }
 0x14e   : > { %2590 = vmatmul.mubr.bf16.gmra.mxu0 %v3966_v60 }
 0x14f   : > { %2597 = vmatprep.mubr.bf16.mxu0 %v3970_v61 }
 0x151   : > { %2695 = vmatmul.mubr.bf16.gmra.mxu1 %v3969_v1 }
 0x152   : > { %3684 = vmatprep.mubr.bf16.mxu1 %v3974_v2 }
 0x156   : > { %2598 = vmatmul.mubr.bf16.gmra.mxu0 %v3973_v3 }
 0x157   : > { %3676 = vmatprep.mubr.bf16.mxu0 %v3976_v5 }
 0x159   : > { %3685 = vmatmul.mubr.bf16.vlgmr.msra.gmra.mxu1 %v3975_v6  ;;  %v3468_v12 = vpop.f32.mrf.mxu1 }
 0x15a   : > { %3688 = vmatprep.mubr.bf16.mxu1 %v3978_v0 }
 0x15b   : > { %v3469_v63 = vpop.f32.mrf.mxu1 }
 0x15c   : > { %v3470_v18 = vadd.f32 %v3469_v63, %v3468_v12 }
 0x15d   : > { %v3471_v19 = vpop.f32.mrf.mxu1 }
 0x15e   : > { %3677 = vmatmul.mubr.bf16.vlgmr.msra.gmra.mxu0 %v3977_v7 }
 0x15f   : > { %3680 = vmatprep.mubr.bf16.mxu0 %v3980_v8  ;;  %v3404_v22 = vpop.f32.mrf.mxu0  ;;  %v3472_v20 = vpop.f32.mrf.mxu1 }
 0x160   : > { %v3473_v21 = vadd.f32 %v3472_v20, %v3471_v19 }
 0x161   : > { %3689 = vmatmul.mubr.bf16.gmra.mxu1 %v3979_v9  ;;  %v3405_v26 = vpop.f32.mrf.mxu0  ;;  %v3474_v28 = vpop.f32.mrf.mxu1 }
 0x162   : > { %v3406_v29 = vadd.f32 %v3405_v26, %v3404_v22 }
 0x163   : > { %v3407_v30 = vpop.f32.mrf.mxu0  ;;  %v3475_v32 = vpop.f32.mrf.mxu1 }
 0x164   : > { %v2350_v17 = vadd.f32 %v3406_v29, %v4739_v25  ;;  %v3476_v33 = vadd.f32 %v3475_v32, %v3474_v28 }
 0x165   : > { %v3408_v35 = vpop.f32.mrf.mxu0  ;;  %v3477_v37 = vpop.f32.mrf.mxu1 }
 0x166   : > { %3681 = vmatmul.mubr.bf16.gmra.mxu0 %v3981_v10  ;;  %v3409_v38 = vadd.f32 %v3408_v35, %v3407_v30  ;;  %v4742_v27 = vadd.f32 %v3470_v18, %v2350_v17 }
 0x167   : > { %v3410_v16 = vpop.f32.mrf.mxu0  ;;  %v3478_v58 = vpop.f32.mrf.mxu1 }
 0x168   : > { %v2353_v40 = vadd.f32 %v3409_v38, %v4739_v25  ;;  %v3479_v39 = vadd.f32 %v3478_v58, %v3477_v37 }
 0x169   : > { %v3411_v62 = vpop.f32.mrf.mxu0 }
 0x16a   : > { %v3412_v14 = vadd.f32 %v3411_v62, %v3410_v16  ;;  %v4745_v24 = vadd.f32 %v3473_v21, %v2353_v40 }
 0x16b   : > { %v3413_v4 = vpop.f32.mrf.mxu0 }
 0x16c   : > { %v2358_v34 = vadd.f32 %v3412_v14, %v4739_v25 }
 0x16d   : > { %v3414_v13 = vpop.f32.mrf.mxu0 }
 0x16e   : > { %v3415_v56 = vadd.f32 %v3414_v13, %v3413_v4  ;;  %v4748_v41 = vadd.f32 %v3476_v33, %v2358_v34 }
 0x170   : > { %v2361_v42 = vadd.f32 %v3415_v56, %v4739_v25 }
 0x172   : > { %v4751_v43 = vadd.f32 %v3479_v39, %v2361_v42 }
 0x17a   : > { %v3480_v44 = vpop.f32.mrf.mxu1 }
 0x17c   : > { %v3481_v45 = vpop.f32.mrf.mxu1 }
 0x17d   : > { %v3416_v23 = vpop.f32.mrf.mxu0  ;;  %v3482_v46 = vadd.f32 %v3481_v45, %v3480_v44 }
 0x17e   : > { %v3483_v11 = vpop.f32.mrf.mxu1 }
 0x17f   : > { %v3417_v47 = vpop.f32.mrf.mxu0 }
 0x180   : > { %v3418_v31 = vadd.f32 %v3417_v47, %v3416_v23  ;;  %v3484_v48 = vpop.f32.mrf.mxu1 }
 0x181   : > { %v3419_v49 = vpop.f32.mrf.mxu0  ;;  %v3485_v51 = vadd.f32 %v3484_v48, %v3483_v11 }
 0x182   : > { %v2366_v50 = vadd.f32 %v3418_v31, %v4739_v25 }
 0x183   : > { %v3420_v52 = vpop.f32.mrf.mxu0 }
 0x184   : > { %v3421_v36 = vadd.f32 %v3420_v52, %v3419_v49  ;;  %v4754_v53 = vadd.f32 %v3482_v46, %v2366_v50 }
 0x186   : > { %v2369_v54 = vadd.f32 %v3421_v36, %v4739_v25 }
 0x188   : > { %v4757_v55 = vadd.f32 %v3485_v51, %v2369_v54 }
 0x18c   : > { %v3486_v57 = vpop.f32.mrf.mxu1 }
 0x18e   : > { %v3487_v59 = vpop.f32.mrf.mxu1 }
 0x18f   : > { %v3422_v15 = vpop.f32.mrf.mxu0  ;;  %v3488_v60 = vadd.f32 %v3487_v59, %v3486_v57 }
 0x190   : > { %v3489_v61 = vpop.f32.mrf.mxu1 }
 0x191   : > { %v3423_v1 = vpop.f32.mrf.mxu0 }
 0x192   : > { %v3424_v2 = vadd.f32 %v3423_v1, %v3422_v15  ;;  %v3490_v3 = vpop.f32.mrf.mxu1 }
 0x193   : > { %v3425_v5 = vpop.f32.mrf.mxu0  ;;  %v3491_v0 = vadd.f32 %v3490_v3, %v3489_v61 }
 0x194   : > { %v2374_v6 = vadd.f32 %v3424_v2, %v4739_v25 }
 0x195   : > { %v3426_v7 = vpop.f32.mrf.mxu0 }
 0x196   : > { %v3427_v8 = vadd.f32 %v3426_v7, %v3425_v5  ;;  %v4760_v9 = vadd.f32 %v3488_v60, %v2374_v6 }
 0x198   : > { %v2377_v10 = vadd.f32 %v3427_v8, %v4739_v25 }
 0x19a   : > { %v4763_v63 = vadd.f32 %v3491_v0, %v2377_v10 }
 0x19b   : > { %v3492_v12 = vpop.f32.mrf.mxu1 }
 0x19d   : > { %v3493_v18 = vpop.f32.mrf.mxu1 }
 0x19e   : > { %v3494_v19 = vadd.f32 %v3493_v18, %v3492_v12 }
 0x19f   : > { %v3495_v20 = vpop.f32.mrf.mxu1 }
 0x1a0   : > { %v3428_v22 = vpop.f32.mrf.mxu0 }
 0x1a1   : > { %v3496_v26 = vpop.f32.mrf.mxu1 }
 0x1a2   : > { %v3429_v21 = vpop.f32.mrf.mxu0  ;;  %v3497_v29 = vadd.f32 %v3496_v26, %v3495_v20 }
 0x1a3   : > { %v3430_v28 = vadd.f32 %v3429_v21, %v3428_v22 }
 0x1a4   : > { %v3431_v30 = vpop.f32.mrf.mxu0 }
 0x1a5   : > { %v2382_v32 = vadd.f32 %v3430_v28, %v4739_v25 }
 0x1a6   : > { %v3432_v17 = vpop.f32.mrf.mxu0 }
 0x1a7   : > { %v3433_v33 = vadd.f32 %v3432_v17, %v3431_v30  ;;  %v4766_v35 = vadd.f32 %v3494_v19, %v2382_v32 }
 0x1a9   : > { %v2385_v37 = vadd.f32 %v3433_v33, %v4739_v25 }
 0x1ab   : > { %v4769_v38 = vadd.f32 %v3497_v29, %v2385_v37 }
 0x1ad   : > { %5025 = vst [vmem:[#allocation22_spill] sm:$0xff] %v4769_v38 }
 0x1b0   : > { %v3498_v16 = vpop.f32.mrf.mxu1 }
 0x1b2   : > { %v3499_v58 = vpop.f32.mrf.mxu1 }
 0x1b3   : > { %v3500_v40 = vadd.f32 %v3499_v58, %v3498_v16  ;;  %v3434_v39 = vpop.f32.mrf.mxu0 }
 0x1b4   : > { %v3501_v62 = vpop.f32.mrf.mxu1 }
 0x1b5   : > { %v3435_v14 = vpop.f32.mrf.mxu0 }
 0x1b6   : > { %v3436_v4 = vadd.f32 %v3435_v14, %v3434_v39  ;;  %v3502_v34 = vpop.f32.mrf.mxu1 }
 0x1b7   : > { %v3503_v13 = vadd.f32 %v3502_v34, %v3501_v62  ;;  %v3437_v56 = vpop.f32.mrf.mxu0 }
 0x1b8   : > { %v2390_v42 = vadd.f32 %v3436_v4, %v4739_v25 }
 0x1b9   : > { %v3438_v44 = vpop.f32.mrf.mxu0 }
 0x1ba   : > { %v3439_v45 = vadd.f32 %v3438_v44, %v3437_v56  ;;  %v4772_v23 = vadd.f32 %v3500_v40, %v2390_v42 }
 0x1bc   : > { %v2393_v46 = vadd.f32 %v3439_v45, %v4739_v25 }
 0x1be   : > { %v4775_v11 = vadd.f32 %v3503_v13, %v2393_v46 }
 0x1c0   : > { %5026 = vst [vmem:[#allocation23_spill] sm:$0xff] %v4775_v11 }
 0x1c1   : > { %v3504_v47 = vpop.f32.mrf.mxu1 }
 0x1c3   : > { %v3505_v31 = vpop.f32.mrf.mxu1 }
 0x1c4   : > { %v3506_v49 = vadd.f32 %v3505_v31, %v3504_v47 }
 0x1c5   : > { %v3440_v48 = vpop.f32.mrf.mxu0  ;;  %v3507_v50 = vpop.f32.mrf.mxu1 }
 0x1c7   : > { %v3441_v51 = vpop.f32.mrf.mxu0  ;;  %v3508_v36 = vpop.f32.mrf.mxu1 }
 0x1c8   : > { %v3442_v52 = vadd.f32 %v3441_v51, %v3440_v48  ;;  %v3509_v59 = vadd.f32 %v3508_v36, %v3507_v50 }
 0x1c9   : > { %v3443_v54 = vpop.f32.mrf.mxu0 }
 0x1ca   : > { %v2398_v57 = vadd.f32 %v3442_v52, %v4739_v25 }
 0x1cb   : > { %v3444_v15 = vpop.f32.mrf.mxu0 }
 0x1cc   : > { %v3445_v60 = vadd.f32 %v3444_v15, %v3443_v54  ;;  %v4778_v61 = vadd.f32 %v3506_v49, %v2398_v57 }
 0x1ce   : > { %5027 = vst [vmem:[#allocation24_spill] sm:$0xff] %v4778_v61  ;;  %v2401_v1 = vadd.f32 %v3445_v60, %v4739_v25 }
 0x1d0   : > { %v4781_v2 = vadd.f32 %v3509_v59, %v2401_v1 }
 0x1d1   : > { %v3510_v3 = vpop.f32.mrf.mxu1 }
 0x1d2   : > { %5028 = vst [vmem:[#allocation25_spill] sm:$0xff] %v4781_v2 }
 0x1d3   : > { %v3511_v5 = vpop.f32.mrf.mxu1 }
 0x1d4   : > { %v3512_v6 = vadd.f32 %v3511_v5, %v3510_v3 }
 0x1d5   : > { %v3513_v7 = vpop.f32.mrf.mxu1 }
 0x1d6   : > { %v3446_v0 = vpop.f32.mrf.mxu0 }
 0x1d7   : > { %v3514_v12 = vpop.f32.mrf.mxu1 }
 0x1d8   : > { %v3447_v8 = vpop.f32.mrf.mxu0  ;;  %v3515_v18 = vadd.f32 %v3514_v12, %v3513_v7 }
 0x1d9   : > { %v3448_v10 = vadd.f32 %v3447_v8, %v3446_v0  ;;  %v3596_v20 = vpop.f32.mrf.mxu1 }
 0x1da   : > { %v3449_v19 = vpop.f32.mrf.mxu0 }
 0x1db   : > { %v2406_v22 = vadd.f32 %v3448_v10, %v4739_v25  ;;  %v3597_v28 = vpop.f32.mrf.mxu1 }
 0x1dc   : > { %v3450_v21 = vpop.f32.mrf.mxu0  ;;  %v3598_v30 = vadd.f32 %v3597_v28, %v3596_v20 }
 0x1dd   : > { %v3451_v26 = vadd.f32 %v3450_v21, %v3449_v19  ;;  %v4784_v29 = vadd.f32 %v3512_v6, %v2406_v22  ;;  %v3599_v33 = vpop.f32.mrf.mxu1 }
 0x1de   : > { %v3532_v32 = vpop.f32.mrf.mxu0 }
 0x1df   : > { %5029 = vst [vmem:[#allocation26_spill] sm:$0xff] %v4784_v29  ;;  %v2409_v17 = vadd.f32 %v3451_v26, %v4739_v25  ;;  %v3600_v58 = vpop.f32.mrf.mxu1 }
 0x1e0   : > { %v3533_v37 = vpop.f32.mrf.mxu0  ;;  %v3601_v44 = vadd.f32 %v3600_v58, %v3599_v33 }
 0x1e1   : > { %v3534_v16 = vadd.f32 %v3533_v37, %v3532_v32  ;;  %v4787_v40 = vadd.f32 %v3515_v18, %v2409_v17  ;;  %v3602_v14 = vpop.f32.mrf.mxu1 }
 0x1e2   : > { %v3535_v39 = vpop.f32.mrf.mxu0 }
 0x1e3   : > { %5030 = vst [vmem:[#allocation27_spill] sm:$0xff] %v4787_v40  ;;  %v2544_v62 = vadd.f32 %v3534_v16, %v4742_v27  ;;  %v3603_v13 = vpop.f32.mrf.mxu1 }
 0x1e4   : > { %v3536_v4 = vpop.f32.mrf.mxu0 }
 0x1e5   : > { %v3537_v34 = vadd.f32 %v3536_v4, %v3535_v39  ;;  %v4790_v56 = vadd.f32 %v3598_v30, %v2544_v62  ;;  %v3605_v25 = vpop.f32.mrf.mxu1 }
 0x1e6   : > { %v3538_v42 = vpop.f32.mrf.mxu0 }
 0x1e7   : > { %5031 = vst [vmem:[#allocation28_spill] sm:$0xff] %v4790_v56  ;;  %v2547_v45 = vadd.f32 %v3537_v34, %v4745_v24  ;;  %v3606_v47 = vpop.f32.mrf.mxu1 }
 0x1e8   : > { %v3539_v46 = vpop.f32.mrf.mxu0 }
 0x1e9   : > { %v4793_v31 = vadd.f32 %v3601_v44, %v2547_v45  ;;  %v3608_v49 = vpop.f32.mrf.mxu1  ;;  %v3540_v58 = vadd.f32 %v3539_v46, %v3538_v42 }
 0x1ea   : > { %v3541_v48 = vpop.f32.mrf.mxu0 }
 0x1eb   : > { %5032 = vst [vmem:[#allocation29_spill] sm:$0xff] %v4793_v31  ;;  %v3609_v51 = vpop.f32.mrf.mxu1  ;;  %v2552_v31 = vadd.f32 %v3540_v58, %v4748_v41  ;;  %v5045_v58 = vld [vmem:[#allocation26_spill] sm:$0xff] }
 0x1ec   : > { %v3542_v50 = vpop.f32.mrf.mxu0 }
 0x1ed   : > { %v3611_v52 = vpop.f32.mrf.mxu1  ;;  %v3543_v62 = vadd.f32 %v3542_v50, %v3541_v48  ;;  %v3610_v50 = vadd.f32 %v3609_v51, %v3608_v49 }
 0x1ee   : > { %v3544_v27 = vpop.f32.mrf.mxu0 }
 0x1ef   : > { %v3612_v54 = vpop.f32.mrf.mxu1  ;;  %v2555_v40 = vadd.f32 %v3543_v62, %v4751_v43 }
 0x1f0   : > { %v3545_v36 = vpop.f32.mrf.mxu0 }
 0x1f1   : > { %v4795_v59 = vpop.f32.mrf.mxu1  ;;  %v3546_v44 = vadd.f32 %v3545_v36, %v3544_v27 }
 0x1f2   : > { %v3547_v57 = vpop.f32.mrf.mxu0 }
 0x1f3   : > { %v4797_v60 = vpop.f32.mrf.mxu1  ;;  %v2560_v42 = vadd.f32 %v3546_v44, %v4754_v53 }
 0x1f4   : > { %v3548_v15 = vpop.f32.mrf.mxu0  ;;  %5033 = vst [vmem:[#allocation30_spill] sm:$0xff] %v4797_v60 }
 0x1f5   : > { %v4799_v1 = vpop.f32.mrf.mxu1  ;;  %v3549_v29 = vadd.f32 %v3548_v15, %v3547_v57 }
 0x1f6   : > { %v3550_v24 = vpop.f32.mrf.mxu0  ;;  %5034 = vst [vmem:[#allocation31_spill] sm:$0xff] %v4799_v1  ;;  %v3607_v1 = vadd.f32 %v3606_v47, %v3605_v25 }
 0x1f7   : > { %v3618_v5 = vpop.f32.mrf.mxu1  ;;  %v2563_v41 = vadd.f32 %v3549_v29, %v4757_v55 }
 0x1f8   : > { %v3551_v3 = vpop.f32.mrf.mxu0 }
 0x1f9   : > { %v4801_v0 = vpop.f32.mrf.mxu1  ;;  %v3552_v11 = vadd.f32 %v3551_v3, %v3550_v24  ;;  %v4815_v3 = vadd.f32 %v3610_v50, %v2560_v42 }
 0x1fa   : > { %v3553_v6 = vpop.f32.mrf.mxu0  ;;  %5035 = vst [vmem:[#allocation32_spill] sm:$0xff] %v4801_v0 }
 0x1fb   : > { %v3621_v8 = vpop.f32.mrf.mxu1  ;;  %v5037_v55 = vld [vmem:[#allocation30_spill] sm:$0xff] }
 0x1fc   : > { %v3554_v7 = vpop.f32.mrf.mxu0 }
 0x1fd   : > { %v4803_v12 = vpop.f32.mrf.mxu1  ;;  %v3555_v0 = vadd.f32 %v3554_v7, %v3553_v6 }
 0x1fe   : > { %v3556_v10 = vpop.f32.mrf.mxu0  ;;  %5036 = vst [vmem:[#allocation33_spill] sm:$0xff] %v4803_v12  ;;  %v3604_v12 = vadd.f32 %v3603_v13, %v3602_v14  ;;  %v3613_v14 = vadd.f32 %v3612_v54, %v3611_v52  ;;  %v2568_v13 = vadd.f32 %v3552_v11, %v4760_v9 }
 0x1ff   : > { %v3624_v19 = vpop.f32.mrf.mxu1  ;;  %v2571_v25 = vadd.f32 %v3555_v0, %v4763_v63 }
 0x200   : > { %v3557_v18 = vpop.f32.mrf.mxu0  ;;  %v2649_v60 = vadd.f32 %v3604_v12, %v2552_v31  ;;  %v4823_v7 = vadd.f32 %v3613_v14, %v2563_v41  ;;  %v5043_v12 = vld [vmem:[#allocation24_spill] sm:$0xff] }
 0x201   : > { %v3626_v20 = vpop.f32.mrf.mxu1  ;;  %v3558_v46 = vadd.f32 %v3557_v18, %v3556_v10  ;;  %v5040_v11 = vld [vmem:[#allocation32_spill] sm:$0xff] }
 0x202   : > { %v3559_v22 = vpop.f32.mrf.mxu0  ;;  %v3622_v63 = vadd.f32 %v3621_v8, %v5040_v11 }
 0x203   : > { %v3627_v26 = vpop.f32.mrf.mxu1  ;;  %v2576_v49 = vadd.f32 %v3558_v46, %v4766_v35 }
 0x204   : > { %v3560_v21 = vpop.f32.mrf.mxu0  ;;  %v3628_v51 = vadd.f32 %v3627_v26, %v3626_v20 }
 0x205   : > { %v3629_v30 = vpop.f32.mrf.mxu1  ;;  %v3561_v27 = vadd.f32 %v3560_v21, %v3559_v22  ;;  %v5044_v21 = vld [vmem:[#allocation25_spill] sm:$0xff] }
 0x206   : > { %v3562_v28 = vpop.f32.mrf.mxu0 }
 0x207   : > { %v3630_v17 = vpop.f32.mrf.mxu1 }
 0x208   : > { %v3563_v32 = vpop.f32.mrf.mxu0 }
 0x209   : > { %v3632_v37 = vpop.f32.mrf.mxu1  ;;  %v3564_v2 = vadd.f32 %v3563_v32, %v3562_v28  ;;  %v4810_v28 = vadd.f32 %v3607_v1, %v2555_v40  ;;  %v5039_v40 = vld [vmem:[#allocation22_spill] sm:$0xff]  ;;  %v5041_v1 = vld [vmem:[#allocation23_spill] sm:$0xff] }
 0x20a   : > { %v3565_v33 = vpop.f32.mrf.mxu0  ;;  %v2579_v52 = vadd.f32 %v3561_v27, %v5039_v40 }
 0x20b   : > { %v3633_v39 = vpop.f32.mrf.mxu1  ;;  %v2584_v43 = vadd.f32 %v3564_v2, %v4772_v23  ;;  %v3616_v23 = vadd.f32 %v5037_v55, %v4795_v59  ;;  %v5038_v2 = vld [vmem:[#allocation31_spill] sm:$0xff] }
 0x20c   : > { %v3566_v16 = vpop.f32.mrf.mxu0  ;;  %v3619_v29 = vadd.f32 %v3618_v5, %v5038_v2  ;;  %v3631_v5 = vadd.f32 %v3630_v17, %v3629_v30  ;;  %v5046_v17 = vld [vmem:[#allocation27_spill] sm:$0xff] }
 0x20d   : > { %v3635_v34 = vpop.f32.mrf.mxu1  ;;  %v3567_v57 = vadd.f32 %v3566_v16, %v3565_v33  ;;  %v2681_v35 = vadd.f32 %v3628_v51, %v2584_v43  ;;  %v2665_v59 = vadd.f32 %v3616_v23, %v2568_v13  ;;  %v2673_v33 = vadd.f32 %v3622_v63, %v2576_v49  ;;  %v5048_v63 = vld [vmem:[#allocation29_spill] sm:$0xff] }
 0x20e   : > { %v3568_v4 = vpop.f32.mrf.mxu0  ;;  %v4827_v20 = vadd.f32 %v3619_v29, %v2571_v25  ;;  %v3634_v16 = vadd.f32 %v3633_v39, %v3632_v37  ;;  %v5047_v25 = vld [vmem:[#allocation28_spill] sm:$0xff] }
 0x20f   : > { %v3636_v56 = vpop.f32.mrf.mxu1  ;;  %v2587_v6 = vadd.f32 %v3567_v57, %v5041_v1 }
 0x210   : > { %v3569_v45 = vpop.f32.mrf.mxu0 }
 0x211   : > { %v3638_v38 = vpop.f32.mrf.mxu1  ;;  %v3570_v53 = vadd.f32 %v3569_v45, %v3568_v4  ;;  %v2684_v50 = vadd.f32 %v3631_v5, %v2587_v6 }
 0x212   : > { %v3571_v61 = vpop.f32.mrf.mxu0 }
 0x213   : > { %v3639_v36 = vpop.f32.mrf.mxu1  ;;  %v2592_v18 = vadd.f32 %v3570_v53, %v5043_v12 }
 0x214   : > { %v3572_v48 = vpop.f32.mrf.mxu0  ;;  %v3640_v30 = vadd.f32 %v3639_v36, %v3638_v38 }
 0x215   : > { %v3641_v47 = vpop.f32.mrf.mxu1  ;;  %v3573_v24 = vadd.f32 %v3572_v48, %v3571_v61  ;;  %v5042_v61 = vld [vmem:[#allocation33_spill] sm:$0xff]  ;;  %v2689_v57 = vadd.f32 %v3634_v16, %v2592_v18 }
 0x216   : > { %v3574_v15 = vpop.f32.mrf.mxu0  ;;  %v3625_v10 = vadd.f32 %v3624_v19, %v5042_v61  ;;  %v3637_v19 = vadd.f32 %v3636_v56, %v3635_v34 }
 0x217   : > { %v3642_v9 = vpop.f32.mrf.mxu1  ;;  %v2595_v26 = vadd.f32 %v3573_v24, %v5044_v21 }
 0x218   : > { %v3575_v31 = vpop.f32.mrf.mxu0  ;;  %v2676_v45 = vadd.f32 %v3625_v10, %v2579_v52  ;;  %v3643_v34 = vadd.f32 %v3642_v9, %v3641_v47 }
 0x219   : > { %v3576_v54 = vadd.f32 %v3575_v31, %v3574_v15  ;;  %v3686_v22 = vpop.f32.mrf.mxu1  ;;  %v2692_v56 = vadd.f32 %v3637_v19, %v2595_v26 }
 0x21a   : > { %v3577_v0 = vpop.f32.mrf.mxu0  ;;  %v4830_v32 = vadd.f32 %v3686_v22, %v2681_v35 }
 0x21b   : > { %v2600_v62 = vadd.f32 %v3576_v54, %v5045_v58  ;;  %v2769_v44 = vpop.f32.mrf.mxu1 }
 0x21c   : > { %v3578_v8 = vpop.f32.mrf.mxu0  ;;  %v2810_v42 = vsub.f32 0.0, %v4830_v32  ;;  %v4834_v46 = vadd.f32 %v2769_v44, %v2673_v33 }
 0x21d   : > { %v3579_v4 = vadd.f32 %v3578_v8, %v3577_v0  ;;  %v3687_v43 = vpop.f32.mrf.mxu1  ;;  %v2697_v36 = vadd.f32 %v3640_v30, %v2600_v62 }
 0x21e   : > { %v3678_v48 = vpop.f32.mrf.mxu0  ;;  %v2836_v37 = vmul.f32 1.442695, %v2810_v42  ;;  %v2808_v39 = vsub.f32 0.0, %v4834_v46  ;;  %v4840_v15 = vadd.f32 %v3687_v43, %v2684_v50 }
 0x21f   : > { %v2603_v27 = vadd.f32 %v3579_v4, %v5046_v17  ;;  %v4837_v41 = vadd.f32 %v3678_v48, %v2649_v60  ;;  %v2772_v38 = vpop.f32.mrf.mxu1 }
 0x220   : > { %v2737_v14 = vpop.f32.mrf.mxu0  ;;  %3982 = vpow2.f32 %v2836_v37  ;;  %v2832_v60 = vmul.f32 1.442695, %v2808_v39  ;;  %v2811_v49 = vsub.f32 0.0, %v4840_v15  ;;  %v4847_v51 = vadd.f32 %v2772_v38, %v2676_v45 }
 0x221   : > { %v2802_v13 = vsub.f32 0.0, %v4837_v41  ;;  %v4844_v53 = vadd.f32 %v2737_v14, %v5047_v25  ;;  %v3690_v47 = vpop.f32.mrf.mxu1  ;;  %v2700_v2 = vadd.f32 %v3643_v34, %v2603_v27 }
 0x222   : > { %v3679_v24 = vpop.f32.mrf.mxu0  ;;  %3984 = vpow2.f32 %v2832_v60  ;;  %v2838_v29 = vmul.f32 1.442695, %v2811_v49  ;;  %v2809_v40 = vsub.f32 0.0, %v4847_v51  ;;  %v4854_v52 = vadd.f32 %v3690_v47, %v2697_v36 }
 0x223   : > { %v2820_v31 = vmul.f32 1.442695, %v2802_v13  ;;  %v2800_v55 = vsub.f32 0.0, %v4844_v53  ;;  %v4851_v23 = vadd.f32 %v3679_v24, %v4810_v28  ;;  %v2785_v6 = vpop.f32.mrf.mxu1 }
 0x224   : > { %v2740_v54 = vpop.f32.mrf.mxu0  ;;  %v2834_v28 = vmul.f32 1.442695, %v2809_v40  ;;  %v2814_v0 = vsub.f32 0.0, %v4854_v52  ;;  %v4861_v35 = vadd.f32 %v2785_v6, %v2689_v57 }
 0x225   : > { %3986 = vpow2.f32 %v2820_v31  ;;  %v2816_v9 = vmul.f32 1.442695, %v2800_v55  ;;  %v2803_v11 = vsub.f32 0.0, %v4851_v23  ;;  %v4858_v1 = vadd.f32 %v2740_v54, %v5048_v63  ;;  %v3691_v22 = vpop.f32.mrf.mxu1 }
 0x226   : > { %3988 = vpow2.f32 %v2838_v29  ;;  %v3682_v61 = vpop.f32.mrf.mxu0  ;;  %v2844_v5 = vmul.f32 1.442695, %v2814_v0  ;;  %v2812_v21 = vsub.f32 0.0, %v4861_v35  ;;  %v4867_v26 = vadd.f32 %v3691_v22, %v2700_v2 }
 0x227   : > { %3990 = vpow2.f32 %v2816_v9  ;;  %v2822_v10 = vmul.f32 1.442695, %v2803_v11  ;;  %v2801_v12 = vsub.f32 0.0, %v4858_v1  ;;  %v4864_v18 = vadd.f32 %v3682_v61, %v2665_v59  ;;  %v2788_v62 = vpop.f32.mrf.mxu1 }
 0x228   : > { %3992 = vpow2.f32 %v2834_v28  ;;  %v2753_v8 = vpop.f32.mrf.mxu0  ;;  %v2840_v4 = vmul.f32 1.442695, %v2812_v21  ;;  %v2815_v59 = vsub.f32 0.0, %v4867_v26  ;;  %v4874_v44 = vadd.f32 %v2788_v62, %v2692_v56 }
 0x229   : > { %3994 = vpow2.f32 %v2822_v10  ;;  %v2818_v33 = vmul.f32 1.442695, %v2801_v12  ;;  %v2806_v16 = vsub.f32 0.0, %v4864_v18  ;;  %v4871_v58 = vadd.f32 %v2753_v8, %v4815_v3 }
 0x22a   : > { %3996 = vpow2.f32 %v2844_v5  ;;  %v3683_v45 = vpop.f32.mrf.mxu0  ;;  %v2846_v50 = vmul.f32 1.442695, %v2815_v59  ;;  %v2813_v3 = vsub.f32 0.0, %v4874_v44 }
 0x22b   : > { %3998 = vpow2.f32 %v2818_v33  ;;  %v2828_v19 = vmul.f32 1.442695, %v2806_v16  ;;  %v2804_v42 = vsub.f32 0.0, %v4871_v58  ;;  %v4878_v48 = vadd.f32 %v3683_v45, %v4827_v20 }
 0x22c   : > { %4000 = vpow2.f32 %v2840_v4  ;;  %v2756_v30 = vpop.f32.mrf.mxu0  ;;  %v2842_v57 = vmul.f32 1.442695, %v2813_v3 }
 0x22d   : > { %4002 = vpow2.f32 %v2828_v19  ;;  %v2824_v17 = vmul.f32 1.442695, %v2804_v42  ;;  %v2807_v27 = vsub.f32 0.0, %v4878_v48  ;;  %v4883_v43 = vadd.f32 %v2756_v30, %v4823_v7  ;;  %v3983_v37 = vpop.eup %3982 }
 0x22e   : > { %4004 = vpow2.f32 %v2846_v50  ;;  %v2858_v14 = vadd.f32 1.0, %v3983_v37 }
 0x22f   : > { %4006 = vpow2.f32 %v2824_v17  ;;  %v2830_v39 = vmul.f32 1.442695, %v2807_v27  ;;  %v2805_v20 = vsub.f32 0.0, %v4883_v43  ;;  %v3985_v56 = vpop.eup %3984 }
 0x230   : > { %4008 = vpow2.f32 %v2842_v57  ;;  %v2856_v25 = vadd.f32 1.0, %v3985_v56 }
 0x231   : > { %4010 = vpow2.f32 %v2830_v39  ;;  %v2826_v34 = vmul.f32 1.442695, %v2805_v20 }
 0x232   : > { %v3987_v13 = vpop.eup %3986  ;;  %4012 = vrcp.f32 %v2858_v14 }
 0x233   : > { %v3989_v38 = vpop.eup %3988  ;;  %v2850_v36 = vadd.f32 1.0, %v3987_v13  ;;  %4014 = vpow2.f32 %v2826_v34 }
 0x234   : > { %v3991_v7 = vpop.eup %3990  ;;  %4016 = vrcp.f32 %v2856_v25  ;;  %v2859_v60 = vadd.f32 1.0, %v3989_v38 }
 0x235   : > { %v3993_v49 = vpop.eup %3992  ;;  %4018 = vrcp.f32 %v2850_v36  ;;  %v2848_v24 = vadd.f32 1.0, %v3991_v7 }
 0x236   : > { %v3995_v31 = vpop.eup %3994  ;;  %4020 = vrcp.f32 %v2859_v60  ;;  %v2857_v55 = vadd.f32 1.0, %v3993_v49 }
 0x237   : > { %v3997_v47 = vpop.eup %3996  ;;  %4022 = vrcp.f32 %v2848_v24  ;;  %v2851_v2 = vadd.f32 1.0, %v3995_v31 }
 0x238   : > { %v3999_v29 = vpop.eup %3998  ;;  %4024 = vrcp.f32 %v2857_v55  ;;  %v2862_v40 = vadd.f32 1.0, %v3997_v47 }
 0x239   : > { %v4001_v54 = vpop.eup %4000  ;;  %4026 = vrcp.f32 %v2851_v2  ;;  %v2849_v9 = vadd.f32 1.0, %v3999_v29 }
 0x23a   : > { %v4003_v11 = vpop.eup %4002  ;;  %4028 = vrcp.f32 %v2862_v40  ;;  %v2860_v63 = vadd.f32 1.0, %v4001_v54 }
 0x23b   : > { %v4005_v6 = vpop.eup %4004  ;;  %4030 = vrcp.f32 %v2849_v9  ;;  %v2854_v28 = vadd.f32 1.0, %v4003_v11 }
 0x23c   : > { %v4007_v0 = vpop.eup %4006  ;;  %4032 = vrcp.f32 %v2860_v63  ;;  %v2863_v61 = vadd.f32 1.0, %v4005_v6 }
 0x23d   : > { %v4009_v10 = vpop.eup %4008  ;;  %4034 = vrcp.f32 %v2854_v28  ;;  %v2852_v12 = vadd.f32 1.0, %v4007_v0 }
 0x23e   : > { %v4011_v22 = vpop.eup %4010  ;;  %4036 = vrcp.f32 %v2863_v61  ;;  %v2861_v5 = vadd.f32 1.0, %v4009_v10 }
 0x23f   : > { %v4013_v21 = vpop.eup %4012  ;;  %4038 = vrcp.f32 %v2852_v12  ;;  %v2855_v8 = vadd.f32 1.0, %v4011_v22 }
 0x240   : > { %v4015_v33 = vpop.eup %4014  ;;  %4040 = vrcp.f32 %v2861_v5  ;;  %v2890_v19 = vmul.f32 %v4013_v21, %v4830_v32 }
 0x241   : > { %v4017_v16 = vpop.eup %4016  ;;  %4042 = vrcp.f32 %v2855_v8  ;;  %v2853_v62 = vadd.f32 1.0, %v4015_v33 }
 0x242   : > { %v4019_v4 = vpop.eup %4018  ;;  %v2888_v30 = vmul.f32 %v4017_v16, %v4834_v46 }
 0x243   : > { %v4021_v59 = vpop.eup %4020  ;;  %4044 = vrcp.f32 %v2853_v62  ;;  %v2882_v37 = vmul.f32 %v4019_v4, %v4837_v41 }
 0x244   : > { %v4023_v45 = vpop.eup %4022  ;;  %v2891_v42 = vmul.f32 %v4021_v59, %v4840_v15 }
 0x245   : > { %v4025_v50 = vpop.eup %4024  ;;  %v2880_v46 = vmul.f32 %v4023_v45, %v4844_v53 }
 0x246   : > { %v4027_v3 = vpop.eup %4026  ;;  %v3369_v17 = vpack.c.bf16 %v2891_v42, %v2890_v19  ;;  %v2889_v27 = vmul.f32 %v4025_v50, %v4847_v51 }
 0x247   : > { %v4029_v57 = vpop.eup %4028  ;;  %v2883_v39 = vmul.f32 %v4027_v3, %v4851_v23 }
 0x248   : > { %v4031_v20 = vpop.eup %4030  ;;  %3385 = vst [vmem:[%s4894_s4 + $0x28] sm:$0xff] %v3369_v17   ;;  %v3364_v32 = vpack.c.bf16 %v2889_v27, %v2888_v30  ;;  %v2894_v13 = vmul.f32 %v4029_v57, %v4854_v52 }
 0x249   : > { %v4033_v15 = vpop.eup %4032  ;;  %v3349_v14 = vpack.c.bf16 %v2883_v39, %v2882_v37  ;;  %v2881_v51 = vmul.f32 %v4031_v20, %v4858_v1 }
 0x24a   : > { %v4035_v41 = vpop.eup %4034  ;;  %3384 = vst [vmem:[%s4894_s4 + $0x20] sm:$0xff] %v3364_v32   ;;  %v2892_v1 = vmul.f32 %v4033_v15, %v4861_v35 }
 0x24b   : > { %v4037_v23 = vpop.eup %4036  ;;  %3381 = vst [vmem:[%s4894_s4 + $0x8] sm:$0xff] %v3349_v14   ;;  %v3344_v56 = vpack.c.bf16 %v2881_v51, %v2880_v46  ;;  %v2886_v60 = vmul.f32 %v4035_v41, %v4864_v18 }
 0x24c   : > { %v4039_v34 = vpop.eup %4038  ;;  %v2895_v25 = vmul.f32 %v4037_v23, %v4867_v26 }
 0x24d   : > { %v4041_v38 = vpop.eup %4040  ;;  %3345 = vst [vmem:[%s4894_s4] sm:$0xff] %v3344_v56   ;;  %v2884_v24 = vmul.f32 %v4039_v34, %v4871_v58 }
 0x24e   : > { %v4043_v53 = vpop.eup %4042  ;;  %v3379_v36 = vpack.c.bf16 %v2895_v25, %v2894_v13  ;;  %v2893_v7 = vmul.f32 %v4041_v38, %v4874_v44 }
 0x24f   : > { %v2887_v49 = vmul.f32 %v4043_v53, %v4878_v48 }
 0x250   : > { %v4045_v52 = vpop.eup %4044  ;;  %3387 = vst [vmem:[%s4894_s4 + $0x38] sm:$0xff] %v3379_v36   ;;  %v3374_v26 = vpack.c.bf16 %v2893_v7, %v2892_v1 }
 0x251   : > { %v3359_v31 = vpack.c.bf16 %v2887_v49, %v2886_v60  ;;  %v2885_v35 = vmul.f32 %v4045_v52, %v4883_v43 }
 0x252   : > { %3386 = vst [vmem:[%s4894_s4 + $0x30] sm:$0xff] %v3374_v26  }
 0x253   : > { %3383 = vst [vmem:[%s4894_s4 + $0x18] sm:$0xff] %v3359_v31   ;;  %v3354_v18 = vpack.c.bf16 %v2885_v35, %v2884_v24 }
 0x255   : > { %3382 = vst [vmem:[%s4894_s4 + $0x10] sm:$0xff] %v3354_v18  }
 0x256   : > { %4141 = shalt.err (!%p4138_p0)
}
 0x257   : > { %s4142_s29 = scalar_lea.hbm %s4918_s5, 1024  ;;  %s4146_s15 = scalar_lea.hbm %s5050_s11, 4096 }
 0x258   : > { %p4143_p2 = scmp.ne.s32.totalorder %s4918_s5, %s4142_s29  ;;  %p4147_p9 = scmp.lt.s32.totalorder %s4918_s5, %s5050_s11 }
 0x259   : > { %p4148_p11 = scmp.lt.s32.totalorder %s4146_s15, %s4142_s29 }
 0x25a   : > { %p4144_p6 = pnand %p4143_p2, %p4354_p12 }
 0x25b   : > { %p4149_p10 = por %p4148_p11, %p4147_p9 }
 0x25c   : > { %p4145_p7 = pneg %p4144_p6 }
 0x25e   : > { %p4150_p1 = pnand %p4149_p10, %p4145_p7 }
 0x260   : > { %4153 = shalt.err (!%p4150_p1)
}
 0x261   : > { %s4240_s23 = smov 64   ;;  %s4241_s25 = smov 4  }
 0x262   : > { %3716 = dma.vmem_to_hbm [thread:$0]  (%p4354_p12), %s4920_s19, 1024, %s4918_s5, %s2977_s14, %s4240_s23, %s4240_s23, %s4241_s25  }
 0x263 PF: > { %s5051_s4 = sld [smem:[#allocation15_spill]]  ;;  %p3736_p4 = scmp.ge.s32.totalorder %s4232_s22, 2 }
 0x264   : > { %s5052_s26 = sld [smem:[#allocation17_spill]] }
 0x269   : > { %s3009_s13 = sand.u32 1, %s5051_s4  }
 0x26a   : > { %p5053_p8 = scmp.ne.s32.totalorder %s5052_s26, 0  ;;  %s3010_s28 = scalar_lea.sflag [#allocation6], %s3009_s13 }
 0x26c   : > { %p3730_p3 = pnand %p3736_p4, %p5053_p8 }
 0x26e   : > { %p3731_p5 = pneg %p3730_p3 }
 0x270   : > { %4199 = dma.done.wait (%p3731_p5), %s3010_s28, 1024  }
 0x271   : > { %4201 = vsyncadd (%p3731_p5), %s3010_s28, 4294966272  ;;  %s23_s22 = sadd.s32 1, %s4232_s22   ;;  %s5054_s18 = sld [smem:[#allocation16_spill]] }
 0x272   : > { %p20_p13 = scmp.ge.s32.totalorder %s23_s22, 6   ;;  %s5055_s17 = sld [smem:[#allocation21_spill]] }
 0x273   : > { %s5056_s0 = sld [smem:[#allocation18_spill]]  ;;  %s5058_s15 = smov %s4208_s16 }
 0x274   : > { %s5057_s7 = sld [smem:[#allocation20_spill]]  ;;  %s5061_s19 = smov %s4228_s21 }
 0x276   :  { %22 = sbr.rel (!%p20_p13) target bundleno = 13 (0xd), region = 106 }
 0x277   : > { %s5059_s16 = smov %s5054_s18  ;;  %s5060_s18 = smov %s4224_s20 }
 0x279   : > { %s5062_s20 = smov %s5056_s0 }
 0x27a   : > { %s5063_s21 = smov %s5057_s7 }
 0x27b   :  { %3015 = vsyncpa [#allocation5], 1 }
 0x27c   :  { %3017 = vsyncpa [#allocation5 + $0x1], 1 }
 0x27d   :  { %3018 = vsyncpa [#allocation8], 1 }
 0x27e   :  { %3020 = vsyncpa [#allocation8 + $0x1], 1 }
 0x27f   :  { %3021 = vsyncpa [#allocation6], 1 }
 0x280   :  { %3023 = vsyncpa [#allocation6 + $0x1], 1 }

</bundles_post_ra>
